<compile_context>
chip_gen: v7x
topology: tpu7x:2x2x1
jax: 0.10.0
libtpu: 0.0.40
codegen_flags: <defaults>
</compile_context>

<pallas_src>
import functools
import numpy as np
import jax
import jax.numpy as jnp
from jax import lax
from jax.experimental import pallas as pl
from jax.experimental.pallas import tpu as pltpu


# ----------------------------- fused kernel -------------------------------- #

def _fused_attn_kernel(x_ref, qkv_w_ref, qkv_b_ref, proj_w_ref, proj_b_ref,
                       *rest, num_heads, head_dim, seq_len, batch_block):
    # rest = (mask_ref, o_ref, ctx_ref) for the Local mixer,
    #        (o_ref, ctx_ref)           for Global.
    if len(rest) == 3:
        mask_ref, o_ref, ctx_ref = rest
    else:
        o_ref, ctx_ref = rest
        mask_ref = None

    C = num_heads * head_dim
    N = seq_len
    cdt = qkv_w_ref.dtype                    # MXU compute dtype (bf16 or f32)

    # (Bb*N, C) flattened rows for this batch block; cast once for the MXU.
    x2d = x_ref[...].astype(cdt)

    # Flattened QKV projection over all Bb*N rows: one MXU-shaped GEMM.
    # The softmax scale is already folded into the Q columns of qkv_w.
    qkv = lax.dot_general(x2d, qkv_w_ref[...], (((1,), (0,)), ((), ())),
                          preferred_element_type=jnp.float32)
    qkv = (qkv + qkv_b_ref[...].astype(jnp.float32)).astype(cdt)   # (Bb*N, 3C)

    if mask_ref is not None:
        # Finite large-negative additive bias (bf16 in HBM), hoisted out of the
        # batch/head loops; upcast once to f32 for the score add.
        bias = mask_ref[...].astype(jnp.float32)                   # (N, N)

    # Per-batch-element, per-head attention.  Static unroll (small counts).
    for b in range(batch_block):
        r0 = b * N
        blk = qkv[r0:r0 + N, :]                                    # (N, 3C)
        for h in range(num_heads):
            lo = h * head_dim
            q = blk[:, lo:lo + head_dim]                           # (N, hd)
            k = blk[:, C + lo:C + lo + head_dim]                   # (N, hd)
            v = blk[:, 2 * C + lo:2 * C + lo + head_dim]           # (N, hd)

            # Scores: contract head_dim directly (no materialized K^T), f32 acc.
            s = lax.dot_general(q, k, (((1,), (1,)), ((), ())),
                                preferred_element_type=jnp.float32)  # (N, N)
            if mask_ref is not None:
                s = s + bias

            # Softmax over keys (f32 math, EUP approximate reciprocal).
            s = s - jnp.max(s, axis=-1, keepdims=True)
            p = jnp.exp(s)
            p = p * pl.reciprocal(jnp.sum(p, axis=-1, keepdims=True),
                                  approx=True)

            o_h = lax.dot_general(p.astype(cdt), v, (((1,), (0,)), ((), ())),
                                  preferred_element_type=jnp.float32)
            # Write this head's context straight into the f32 VMEM scratch:
            # no concatenate, head intermediates die here.
            ctx_ref[r0:r0 + N, lo:lo + head_dim] = o_h

    # Output projection over the full (Bb*N, C) context slab, f32 acc.
    ctx = ctx_ref[...].astype(cdt)
    out = lax.dot_general(ctx, proj_w_ref[...], (((1,), (0,)), ((), ())),
                          preferred_element_type=jnp.float32)
    out = out + proj_b_ref[...].astype(jnp.float32)
    o_ref[...] = out.astype(o_ref.dtype)      # lane-dense (Bb*N, C) store


# ------------------------------ wrappers ------------------------------------ #

def _pick_batch_block(B, N, C, vmem_budget=6 << 20):
    """Largest divisor of B that keeps >=2 grid steps (v7x: 2 TCs) and fits a
    modest live-VMEM budget (qkv f32 + ctx scratch + double-buffered tiles)."""
    best = 1
    for bb in range(1, B + 1):
        if B % bb:
            continue
        if B >= 2 and B // bb < 2:
            continue                     # keep both v7x TensorCores busy
        rows = bb * N
        est = (rows * 3 * C * 4          # qkv f32
               + rows * C * 4            # ctx scratch f32
               + 4 * rows * C * 4        # double-buffered in/out tiles (worst case f32)
               + 2 * N * N * 4)          # live scores + mask
        if est <= vmem_budget:
            best = bb
    return best


def fused_attention(x, qkv_w, qkv_b, proj_w, proj_b, mask, *, num_heads,
                    batch_block=None):
    """x: (B, N, C); qkv_w: (C, 3C); proj_w: (C, C); mask: (N, N) bias or None."""
    B, N, C = x.shape
    head_dim = C // num_heads
    if batch_block is None:
        batch_block = _pick_batch_block(B, N, C)
    assert B % batch_block == 0, "batch_block must divide B"
    grid = (B // batch_block,)
    rows = batch_block * N

    # Present x / out as lane-dense (B*N, C) slabs (free XLA reshapes): the
    # kernel needs no in-kernel layout reshapes and stores are unmasked.
    x2d = x.reshape(B * N, C)

    kern = functools.partial(_fused_attn_kernel, num_heads=num_heads,
                             head_dim=head_dim, seq_len=N,
                             batch_block=batch_block)

    in_specs = [
        pl.BlockSpec((rows, C), lambda i: (i, 0)),         # x rows per step
        pl.BlockSpec((C, 3 * C), lambda i: (0, 0)),        # qkv weight (resident)
        pl.BlockSpec((1, 3 * C), lambda i: (0, 0)),        # qkv bias   (resident)
        pl.BlockSpec((C, C), lambda i: (0, 0)),            # proj weight(resident)
        pl.BlockSpec((1, C), lambda i: (0, 0)),            # proj bias  (resident)
    ]
    args = [x2d, qkv_w, qkv_b.reshape(1, 3 * C), proj_w, proj_b.reshape(1, C)]
    if mask is not None:                                   # Local mixer only
        in_specs.append(pl.BlockSpec((N, N), lambda i: (0, 0)))
        args.append(mask)

    out2d = pl.pallas_call(
        kern,
        out_shape=jax.ShapeDtypeStruct((B * N, C), x.dtype),
        grid_spec=pltpu.PrefetchScalarGridSpec(
            num_scalar_prefetch=0,
            grid=grid,
            in_specs=in_specs,
            out_specs=pl.BlockSpec((rows, C), lambda i: (i, 0)),
            scratch_shapes=[pltpu.VMEM((rows, C), jnp.float32)],  # per-head ctx
        ),
        # Batch-block axis is parallel -> shards across v7x's 2 TensorCores.
        # Working set is small; default scoped-VMEM limit is ample here.
        # TODO(synk): for large N (>~1.5K) add a key-block online-softmax loop.
        compiler_params=pltpu.CompilerParams(
            dimension_semantics=("parallel",)),
    )(*args)
    return out2d.reshape(B, N, C)


@functools.lru_cache(maxsize=None)
def build_local_mask(H, W, hk, wk):
    """PyTorch Local-mixer mask, as a finite large-negative bf16 additive bias."""
    mask = np.ones((H * W, H + hk - 1, W + wk - 1), dtype=np.float32)
    for h in range(H):
        for w in range(W):
            mask[h * W + w, h:h + hk, w:w + wk] = 0.0
    mask = mask[:, hk // 2:H + hk // 2, wk // 2:W + wk // 2].reshape(H * W, H * W)
    bias = np.where(mask == 1.0, -1e30, 0.0).astype(np.float32)
    return jnp.asarray(bias, dtype=jnp.bfloat16)


def prepare_attention_params(params, *, num_heads, qk_scale=None,
                             compute_dtype=jnp.bfloat16):
    """One-time parameter prep: fold softmax scale into the Q columns of the
    qkv projection and cast weights to the MXU compute dtype (bf16 for
    inference).  Biases stay f32 (added after the f32-accumulated matmuls)."""
    qkv_w = jnp.asarray(params["qkv_w"])
    qkv_b = jnp.asarray(params["qkv_b"])
    C = qkv_w.shape[0]
    head_dim = C // num_heads
    scale = qk_scale or head_dim ** (-0.5)
    qkv_w = jnp.concatenate([qkv_w[:, :C] * scale, qkv_w[:, C:]], axis=1)
    qkv_b = jnp.concatenate([qkv_b[:C] * scale, qkv_b[C:]], axis=0)
    return {
        "qkv_w": qkv_w.astype(compute_dtype),
        "qkv_b": qkv_b.astype(jnp.float32),
        "proj_w": jnp.asarray(params["proj_w"]).astype(compute_dtype),
        "proj_b": jnp.asarray(params["proj_b"]).astype(jnp.float32),
    }


def attention_forward(x, prepared, *, num_heads, mixer="Global", HW=None,
                      local_k=(7, 11), batch_block=None):
    """Forward pass equivalent to Attention.forward (dropout p=0)."""
    if mixer == "Local":
        H_, W_ = HW
        mask = build_local_mask(H_, W_, local_k[0], local_k[1])
    else:
        mask = None  # Global: kernel variant without mask input / mask add
    return fused_attention(x, prepared["qkv_w"], prepared["qkv_b"],
                           prepared["proj_w"], prepared["proj_b"], mask,
                           num_heads=num_heads, batch_block=batch_block)


# ------------------------- pure-JAX reference ------------------------------ #

def attention_reference(x, params, *, num_heads, mixer, HW, local_k,
                        qk_scale=None):
    B, N, C = x.shape
    hd = C // num_heads
    scale = qk_scale or hd ** (-0.5)
    qkv = x.reshape(B * N, C) @ params["qkv_w"] + params["qkv_b"]
    qkv = qkv.reshape(B, N, 3, num_heads, hd).transpose(2, 0, 3, 1, 4)
    q, k, v = qkv[0] * scale, qkv[1], qkv[2]
    attn = jnp.einsum("bhqd,bhkd->bhqk", q, k)
    if mixer == "Local":
        H_, W_ = HW
        hk, wk = local_k
        m = np.ones((H_ * W_, H_ + hk - 1, W_ + wk - 1), dtype=np.float32)
        for h in range(H_):
            for w in range(W_):
                m[h * W_ + w, h:h + hk, w:w + wk] = 0.0
        m = m[:, hk // 2:H_ + hk // 2, wk // 2:W_ + wk // 2].reshape(H_ * W_, H_ * W_)
        m = np.where(m == 1.0, -np.inf, 0.0).astype(np.float32)
        attn = attn + jnp.asarray(m)
    attn = jax.nn.softmax(attn, axis=-1)
    o = jnp.einsum("bhqk,bhkd->bhqd", attn, v)
    o = o.transpose(0, 2, 1, 3).reshape(B, N, C)
    return (o.reshape(B * N, C) @ params["proj_w"] + params["proj_b"]
            ).reshape(B, N, C)


# --------------------------------- main ------------------------------------ #

if __name__ == "__main__":
    # Small shapes consistent with the module: dim=32, 4 heads, HW=(4,4) -> N=16.
    # B=8 so batch blocking (Bb=4) gives 2 grid steps with Bb*N=64-row GEMMs.
    B, dim, num_heads = 8, 32, 4
    H, W = 4, 4
    N = H * W
    local_k = (3, 3)

    key = jax.random.PRNGKey(0)
    k1, k2, k3, k4 = jax.random.split(key, 4)

    # Deterministic synthetic parameters (weights stored as (in, out), i.e.
    # PyTorch weight.T; qkv_bias=False -> zero bias for qkv).
    params = {
        "qkv_w": (jax.random.normal(k1, (dim, 3 * dim), jnp.float32) * 0.05),
        "qkv_b": jnp.zeros((3 * dim,), jnp.float32),
        "proj_w": (jax.random.normal(k2, (dim, dim), jnp.float32) * 0.05),
        "proj_b": (jax.random.normal(k3, (dim,), jnp.float32) * 0.01),
    }
    x = jax.random.normal(k4, (B, N, dim), jnp.float32)

    # ---- f32 compute path: exact-semantics check (Local + Global) ----
    prep_f32 = prepare_attention_params(params, num_heads=num_heads,
                                        compute_dtype=jnp.float32)

    out_l = jax.block_until_ready(
        attention_forward(x, prep_f32, num_heads=num_heads, mixer="Local",
                          HW=(H, W), local_k=local_k))
    ref_l = attention_reference(x, params, num_heads=num_heads, mixer="Local",
                                HW=(H, W), local_k=local_k)
    np.testing.assert_allclose(np.asarray(out_l), np.asarray(ref_l),
                               rtol=2e-3, atol=2e-3)

    out_g = jax.block_until_ready(
        attention_forward(x, prep_f32, num_heads=num_heads, mixer="Global",
                          HW=(H, W)))
    ref_g = attention_reference(x, params, num_heads=num_heads, mixer="Global",
                                HW=(H, W), local_k=local_k)
    np.testing.assert_allclose(np.asarray(out_g), np.asarray(ref_g),
                               rtol=2e-3, atol=2e-3)

    # ---- bf16 compute path (inference perf path): loose-tolerance check ----
    prep_bf16 = prepare_attention_params(params, num_heads=num_heads,
                                         compute_dtype=jnp.bfloat16)
    out_l16 = jax.block_until_ready(
        attention_forward(x, prep_bf16, num_heads=num_heads, mixer="Local",
                          HW=(H, W), local_k=local_k))
    np.testing.assert_allclose(np.asarray(out_l16), np.asarray(ref_l),
                               rtol=5e-2, atol=2e-2)

    print("KERNEL_OK")
</pallas_src>

<mosaic_0001>
module attributes {stable_mosaic.version = 11 : i64} {
  func.func @_fused_attn_kernel(%arg0: i32, %arg1: memref<64x32xf32, #tpu.memory_space<vmem>>, %arg2: memref<32x96xf32, #tpu.memory_space<vmem>>, %arg3: memref<1x96xf32, #tpu.memory_space<vmem>>, %arg4: memref<32x32xf32, #tpu.memory_space<vmem>>, %arg5: memref<1x32xf32, #tpu.memory_space<vmem>>, %arg6: memref<16x16xbf16, #tpu.memory_space<vmem>>, %arg7: memref<64x32xf32, #tpu.memory_space<vmem>>, %arg8: memref<64x32xf32, #tpu.memory_space<vmem>>) attributes {dimension_semantics = [#tpu.dimension_semantics<parallel>], iteration_bounds = array<i64: 2>, scalar_prefetch = 0 : i64, scratch_operands = 1 : i64, tpu.core_type = #tpu.core_type<tc>, window_params = [{transform_indices = @transform_0, window_bounds = array<i64: 64, 32>}, {pipeline_mode = #tpu.pipeline_mode<synchronous>, transform_indices = @transform_1, window_bounds = array<i64: 32, 96>}, {pipeline_mode = #tpu.pipeline_mode<synchronous>, transform_indices = @transform_2, window_bounds = array<i64: 1, 96>}, {pipeline_mode = #tpu.pipeline_mode<synchronous>, transform_indices = @transform_3, window_bounds = array<i64: 32, 32>}, {pipeline_mode = #tpu.pipeline_mode<synchronous>, transform_indices = @transform_4, window_bounds = array<i64: 1, 32>}, {pipeline_mode = #tpu.pipeline_mode<synchronous>, transform_indices = @transform_5, window_bounds = array<i64: 16, 16>}, {transform_indices = @transform_6, window_bounds = array<i64: 64, 32>}]} {
    %c0 = arith.constant 0 : index
    %c0_0 = arith.constant 0 : index
    %0 = vector.load %arg1[%c0, %c0_0] : memref<64x32xf32, #tpu.memory_space<vmem>>, vector<64x32xf32>
    %c0_1 = arith.constant 0 : index
    %c0_2 = arith.constant 0 : index
    %1 = vector.load %arg2[%c0_1, %c0_2] : memref<32x96xf32, #tpu.memory_space<vmem>>, vector<32x96xf32>
    %cst = arith.constant dense<0.000000e+00> : vector<64x96xf32>
    %2 = tpu.matmul %0, %1, %cst {dimension_numbers = #tpu.dot_dimension_numbers<[1], [0], [0], [1], [0, 0, 1, 1], [], []>} : vector<64x32xf32>, vector<32x96xf32>, vector<64x96xf32> -> vector<64x96xf32>
    %c0_3 = arith.constant 0 : index
    %c0_4 = arith.constant 0 : index
    %3 = vector.load %arg3[%c0_3, %c0_4] : memref<1x96xf32, #tpu.memory_space<vmem>>, vector<1x96xf32>
    %4 = vector.broadcast %3 : vector<1x96xf32> to vector<64x96xf32>
    %5 = arith.addf %2, %4 : vector<64x96xf32>
    %c0_5 = arith.constant 0 : index
    %c0_6 = arith.constant 0 : index
    %6 = vector.load %arg6[%c0_5, %c0_6] : memref<16x16xbf16, #tpu.memory_space<vmem>>, vector<16x16xbf16>
    %7 = arith.extf %6 : vector<16x16xbf16> to vector<16x16xf32>
    %8 = vector.extract_strided_slice %5 {offsets = [0, 0], sizes = [16, 96], strides = [1, 1]} : vector<64x96xf32> to vector<16x96xf32>
    %9 = vector.extract_strided_slice %8 {offsets = [0, 0], sizes = [16, 8], strides = [1, 1]} : vector<16x96xf32> to vector<16x8xf32>
    %10 = vector.extract_strided_slice %8 {offsets = [0, 32], sizes = [16, 8], strides = [1, 1]} : vector<16x96xf32> to vector<16x8xf32>
    %11 = vector.extract_strided_slice %8 {offsets = [0, 64], sizes = [16, 8], strides = [1, 1]} : vector<16x96xf32> to vector<16x8xf32>
    %cst_7 = arith.constant dense<0.000000e+00> : vector<16x16xf32>
    %12 = tpu.matmul %9, %10, %cst_7 {dimension_numbers = #tpu.dot_dimension_numbers<[1], [1], [0], [0], [0, 0, 1, 0], [], []>} : vector<16x8xf32>, vector<16x8xf32>, vector<16x16xf32> -> vector<16x16xf32>
    %13 = arith.addf %12, %7 : vector<16x16xf32>
    %cst_8 = arith.constant dense<0xFF800000> : vector<16xf32>
    %14 = vector.multi_reduction <maximumf>, %13, %cst_8 [1] : vector<16x16xf32> to vector<16xf32>
    %15 = vector.shape_cast %14 : vector<16xf32> to vector<16x1xf32>
    %16 = vector.broadcast %15 : vector<16x1xf32> to vector<16x16xf32>
    %17 = arith.subf %13, %16 : vector<16x16xf32>
    %18 = math.exp %17 : vector<16x16xf32>
    %cst_9 = arith.constant dense<0.000000e+00> : vector<16xf32>
    %19 = vector.multi_reduction <add>, %18, %cst_9 [1] : vector<16x16xf32> to vector<16xf32>
    %20 = vector.shape_cast %19 : vector<16xf32> to vector<16x1xf32>
    %21 = tpu.reciprocal %20 {approx = true} : vector<16x1xf32> -> vector<16x1xf32>
    %22 = vector.broadcast %21 : vector<16x1xf32> to vector<16x16xf32>
    %23 = arith.mulf %18, %22 : vector<16x16xf32>
    %cst_10 = arith.constant dense<0.000000e+00> : vector<16x8xf32>
    %24 = tpu.matmul %23, %11, %cst_10 {dimension_numbers = #tpu.dot_dimension_numbers<[1], [0], [0], [1], [0, 0, 1, 1], [], []>} : vector<16x16xf32>, vector<16x8xf32>, vector<16x8xf32> -> vector<16x8xf32>
    %c0_11 = arith.constant 0 : index
    %c0_12 = arith.constant 0 : index
    %25 = vector.load %arg8[%c0_11, %c0_12] : memref<64x32xf32, #tpu.memory_space<vmem>>, vector<16x8xf32>
    tpu.vector_store %arg8[%c0_11, %c0_12], %24 {strides = array<i32>} : memref<64x32xf32, #tpu.memory_space<vmem>>, vector<16x8xf32>,
    %26 = vector.extract_strided_slice %8 {offsets = [0, 8], sizes = [16, 8], strides = [1, 1]} : vector<16x96xf32> to vector<16x8xf32>
    %27 = vector.extract_strided_slice %8 {offsets = [0, 40], sizes = [16, 8], strides = [1, 1]} : vector<16x96xf32> to vector<16x8xf32>
    %28 = vector.extract_strided_slice %8 {offsets = [0, 72], sizes = [16, 8], strides = [1, 1]} : vector<16x96xf32> to vector<16x8xf32>
    %cst_13 = arith.constant dense<0.000000e+00> : vector<16x16xf32>
    %29 = tpu.matmul %26, %27, %cst_13 {dimension_numbers = #tpu.dot_dimension_numbers<[1], [1], [0], [0], [0, 0, 1, 0], [], []>} : vector<16x8xf32>, vector<16x8xf32>, vector<16x16xf32> -> vector<16x16xf32>
    %30 = arith.addf %29, %7 : vector<16x16xf32>
    %cst_14 = arith.constant dense<0xFF800000> : vector<16xf32>
    %31 = vector.multi_reduction <maximumf>, %30, %cst_14 [1] : vector<16x16xf32> to vector<16xf32>
    %32 = vector.shape_cast %31 : vector<16xf32> to vector<16x1xf32>
    %33 = vector.broadcast %32 : vector<16x1xf32> to vector<16x16xf32>
    %34 = arith.subf %30, %33 : vector<16x16xf32>
    %35 = math.exp %34 : vector<16x16xf32>
    %cst_15 = arith.constant dense<0.000000e+00> : vector<16xf32>
    %36 = vector.multi_reduction <add>, %35, %cst_15 [1] : vector<16x16xf32> to vector<16xf32>
    %37 = vector.shape_cast %36 : vector<16xf32> to vector<16x1xf32>
    %38 = tpu.reciprocal %37 {approx = true} : vector<16x1xf32> -> vector<16x1xf32>
    %39 = vector.broadcast %38 : vector<16x1xf32> to vector<16x16xf32>
    %40 = arith.mulf %35, %39 : vector<16x16xf32>
    %cst_16 = arith.constant dense<0.000000e+00> : vector<16x8xf32>
    %41 = tpu.matmul %40, %28, %cst_16 {dimension_numbers = #tpu.dot_dimension_numbers<[1], [0], [0], [1], [0, 0, 1, 1], [], []>} : vector<16x16xf32>, vector<16x8xf32>, vector<16x8xf32> -> vector<16x8xf32>
    %c0_17 = arith.constant 0 : index
    %c8 = arith.constant 8 : index
    %42 = vector.load %arg8[%c0_17, %c8] : memref<64x32xf32, #tpu.memory_space<vmem>>, vector<16x8xf32>
    tpu.vector_store %arg8[%c0_17, %c8], %41 {strides = array<i32>} : memref<64x32xf32, #tpu.memory_space<vmem>>, vector<16x8xf32>,
    %43 = vector.extract_strided_slice %8 {offsets = [0, 16], sizes = [16, 8], strides = [1, 1]} : vector<16x96xf32> to vector<16x8xf32>
    %44 = vector.extract_strided_slice %8 {offsets = [0, 48], sizes = [16, 8], strides = [1, 1]} : vector<16x96xf32> to vector<16x8xf32>
    %45 = vector.extract_strided_slice %8 {offsets = [0, 80], sizes = [16, 8], strides = [1, 1]} : vector<16x96xf32> to vector<16x8xf32>
    %cst_18 = arith.constant dense<0.000000e+00> : vector<16x16xf32>
    %46 = tpu.matmul %43, %44, %cst_18 {dimension_numbers = #tpu.dot_dimension_numbers<[1], [1], [0], [0], [0, 0, 1, 0], [], []>} : vector<16x8xf32>, vector<16x8xf32>, vector<16x16xf32> -> vector<16x16xf32>
    %47 = arith.addf %46, %7 : vector<16x16xf32>
    %cst_19 = arith.constant dense<0xFF800000> : vector<16xf32>
    %48 = vector.multi_reduction <maximumf>, %47, %cst_19 [1] : vector<16x16xf32> to vector<16xf32>
    %49 = vector.shape_cast %48 : vector<16xf32> to vector<16x1xf32>
    %50 = vector.broadcast %49 : vector<16x1xf32> to vector<16x16xf32>
    %51 = arith.subf %47, %50 : vector<16x16xf32>
    %52 = math.exp %51 : vector<16x16xf32>
    %cst_20 = arith.constant dense<0.000000e+00> : vector<16xf32>
    %53 = vector.multi_reduction <add>, %52, %cst_20 [1] : vector<16x16xf32> to vector<16xf32>
    %54 = vector.shape_cast %53 : vector<16xf32> to vector<16x1xf32>
    %55 = tpu.reciprocal %54 {approx = true} : vector<16x1xf32> -> vector<16x1xf32>
    %56 = vector.broadcast %55 : vector<16x1xf32> to vector<16x16xf32>
    %57 = arith.mulf %52, %56 : vector<16x16xf32>
    %cst_21 = arith.constant dense<0.000000e+00> : vector<16x8xf32>
    %58 = tpu.matmul %57, %45, %cst_21 {dimension_numbers = #tpu.dot_dimension_numbers<[1], [0], [0], [1], [0, 0, 1, 1], [], []>} : vector<16x16xf32>, vector<16x8xf32>, vector<16x8xf32> -> vector<16x8xf32>
    %c0_22 = arith.constant 0 : index
    %c16 = arith.constant 16 : index
    %59 = vector.load %arg8[%c0_22, %c16] : memref<64x32xf32, #tpu.memory_space<vmem>>, vector<16x8xf32>
    tpu.vector_store %arg8[%c0_22, %c16], %58 {strides = array<i32>} : memref<64x32xf32, #tpu.memory_space<vmem>>, vector<16x8xf32>,
    %60 = vector.extract_strided_slice %8 {offsets = [0, 24], sizes = [16, 8], strides = [1, 1]} : vector<16x96xf32> to vector<16x8xf32>
    %61 = vector.extract_strided_slice %8 {offsets = [0, 56], sizes = [16, 8], strides = [1, 1]} : vector<16x96xf32> to vector<16x8xf32>
    %62 = vector.extract_strided_slice %8 {offsets = [0, 88], sizes = [16, 8], strides = [1, 1]} : vector<16x96xf32> to vector<16x8xf32>
    %cst_23 = arith.constant dense<0.000000e+00> : vector<16x16xf32>
    %63 = tpu.matmul %60, %61, %cst_23 {dimension_numbers = #tpu.dot_dimension_numbers<[1], [1], [0], [0], [0, 0, 1, 0], [], []>} : vector<16x8xf32>, vector<16x8xf32>, vector<16x16xf32> -> vector<16x16xf32>
    %64 = arith.addf %63, %7 : vector<16x16xf32>
    %cst_24 = arith.constant dense<0xFF800000> : vector<16xf32>
    %65 = vector.multi_reduction <maximumf>, %64, %cst_24 [1] : vector<16x16xf32> to vector<16xf32>
    %66 = vector.shape_cast %65 : vector<16xf32> to vector<16x1xf32>
    %67 = vector.broadcast %66 : vector<16x1xf32> to vector<16x16xf32>
    %68 = arith.subf %64, %67 : vector<16x16xf32>
    %69 = math.exp %68 : vector<16x16xf32>
    %cst_25 = arith.constant dense<0.000000e+00> : vector<16xf32>
    %70 = vector.multi_reduction <add>, %69, %cst_25 [1] : vector<16x16xf32> to vector<16xf32>
    %71 = vector.shape_cast %70 : vector<16xf32> to vector<16x1xf32>
    %72 = tpu.reciprocal %71 {approx = true} : vector<16x1xf32> -> vector<16x1xf32>
    %73 = vector.broadcast %72 : vector<16x1xf32> to vector<16x16xf32>
    %74 = arith.mulf %69, %73 : vector<16x16xf32>
    %cst_26 = arith.constant dense<0.000000e+00> : vector<16x8xf32>
    %75 = tpu.matmul %74, %62, %cst_26 {dimension_numbers = #tpu.dot_dimension_numbers<[1], [0], [0], [1], [0, 0, 1, 1], [], []>} : vector<16x16xf32>, vector<16x8xf32>, vector<16x8xf32> -> vector<16x8xf32>
    %c0_27 = arith.constant 0 : index
    %c24 = arith.constant 24 : index
    %76 = vector.load %arg8[%c0_27, %c24] : memref<64x32xf32, #tpu.memory_space<vmem>>, vector<16x8xf32>
    tpu.vector_store %arg8[%c0_27, %c24], %75 {strides = array<i32>} : memref<64x32xf32, #tpu.memory_space<vmem>>, vector<16x8xf32>,
    %77 = vector.extract_strided_slice %5 {offsets = [16, 0], sizes = [16, 96], strides = [1, 1]} : vector<64x96xf32> to vector<16x96xf32>
    %78 = vector.extract_strided_slice %77 {offsets = [0, 0], sizes = [16, 8], strides = [1, 1]} : vector<16x96xf32> to vector<16x8xf32>
    %79 = vector.extract_strided_slice %77 {offsets = [0, 32], sizes = [16, 8], strides = [1, 1]} : vector<16x96xf32> to vector<16x8xf32>
    %80 = vector.extract_strided_slice %77 {offsets = [0, 64], sizes = [16, 8], strides = [1, 1]} : vector<16x96xf32> to vector<16x8xf32>
    %cst_28 = arith.constant dense<0.000000e+00> : vector<16x16xf32>
    %81 = tpu.matmul %78, %79, %cst_28 {dimension_numbers = #tpu.dot_dimension_numbers<[1], [1], [0], [0], [0, 0, 1, 0], [], []>} : vector<16x8xf32>, vector<16x8xf32>, vector<16x16xf32> -> vector<16x16xf32>
    %82 = arith.addf %81, %7 : vector<16x16xf32>
    %cst_29 = arith.constant dense<0xFF800000> : vector<16xf32>
    %83 = vector.multi_reduction <maximumf>, %82, %cst_29 [1] : vector<16x16xf32> to vector<16xf32>
    %84 = vector.shape_cast %83 : vector<16xf32> to vector<16x1xf32>
    %85 = vector.broadcast %84 : vector<16x1xf32> to vector<16x16xf32>
    %86 = arith.subf %82, %85 : vector<16x16xf32>
    %87 = math.exp %86 : vector<16x16xf32>
    %cst_30 = arith.constant dense<0.000000e+00> : vector<16xf32>
    %88 = vector.multi_reduction <add>, %87, %cst_30 [1] : vector<16x16xf32> to vector<16xf32>
    %89 = vector.shape_cast %88 : vector<16xf32> to vector<16x1xf32>
    %90 = tpu.reciprocal %89 {approx = true} : vector<16x1xf32> -> vector<16x1xf32>
    %91 = vector.broadcast %90 : vector<16x1xf32> to vector<16x16xf32>
    %92 = arith.mulf %87, %91 : vector<16x16xf32>
    %cst_31 = arith.constant dense<0.000000e+00> : vector<16x8xf32>
    %93 = tpu.matmul %92, %80, %cst_31 {dimension_numbers = #tpu.dot_dimension_numbers<[1], [0], [0], [1], [0, 0, 1, 1], [], []>} : vector<16x16xf32>, vector<16x8xf32>, vector<16x8xf32> -> vector<16x8xf32>
    %c16_32 = arith.constant 16 : index
    %c0_33 = arith.constant 0 : index
    %94 = vector.load %arg8[%c16_32, %c0_33] : memref<64x32xf32, #tpu.memory_space<vmem>>, vector<16x8xf32>
    tpu.vector_store %arg8[%c16_32, %c0_33], %93 {strides = array<i32>} : memref<64x32xf32, #tpu.memory_space<vmem>>, vector<16x8xf32>,
    %95 = vector.extract_strided_slice %77 {offsets = [0, 8], sizes = [16, 8], strides = [1, 1]} : vector<16x96xf32> to vector<16x8xf32>
    %96 = vector.extract_strided_slice %77 {offsets = [0, 40], sizes = [16, 8], strides = [1, 1]} : vector<16x96xf32> to vector<16x8xf32>
    %97 = vector.extract_strided_slice %77 {offsets = [0, 72], sizes = [16, 8], strides = [1, 1]} : vector<16x96xf32> to vector<16x8xf32>
    %cst_34 = arith.constant dense<0.000000e+00> : vector<16x16xf32>
    %98 = tpu.matmul %95, %96, %cst_34 {dimension_numbers = #tpu.dot_dimension_numbers<[1], [1], [0], [0], [0, 0, 1, 0], [], []>} : vector<16x8xf32>, vector<16x8xf32>, vector<16x16xf32> -> vector<16x16xf32>
    %99 = arith.addf %98, %7 : vector<16x16xf32>
    %cst_35 = arith.constant dense<0xFF800000> : vector<16xf32>
    %100 = vector.multi_reduction <maximumf>, %99, %cst_35 [1] : vector<16x16xf32> to vector<16xf32>
    %101 = vector.shape_cast %100 : vector<16xf32> to vector<16x1xf32>
    %102 = vector.broadcast %101 : vector<16x1xf32> to vector<16x16xf32>
    %103 = arith.subf %99, %102 : vector<16x16xf32>
    %104 = math.exp %103 : vector<16x16xf32>
    %cst_36 = arith.constant dense<0.000000e+00> : vector<16xf32>
    %105 = vector.multi_reduction <add>, %104, %cst_36 [1] : vector<16x16xf32> to vector<16xf32>
    %106 = vector.shape_cast %105 : vector<16xf32> to vector<16x1xf32>
    %107 = tpu.reciprocal %106 {approx = true} : vector<16x1xf32> -> vector<16x1xf32>
    %108 = vector.broadcast %107 : vector<16x1xf32> to vector<16x16xf32>
    %109 = arith.mulf %104, %108 : vector<16x16xf32>
    %cst_37 = arith.constant dense<0.000000e+00> : vector<16x8xf32>
    %110 = tpu.matmul %109, %97, %cst_37 {dimension_numbers = #tpu.dot_dimension_numbers<[1], [0], [0], [1], [0, 0, 1, 1], [], []>} : vector<16x16xf32>, vector<16x8xf32>, vector<16x8xf32> -> vector<16x8xf32>
    %c16_38 = arith.constant 16 : index
    %c8_39 = arith.constant 8 : index
    %111 = vector.load %arg8[%c16_38, %c8_39] : memref<64x32xf32, #tpu.memory_space<vmem>>, vector<16x8xf32>
    tpu.vector_store %arg8[%c16_38, %c8_39], %110 {strides = array<i32>} : memref<64x32xf32, #tpu.memory_space<vmem>>, vector<16x8xf32>,
    %112 = vector.extract_strided_slice %77 {offsets = [0, 16], sizes = [16, 8], strides = [1, 1]} : vector<16x96xf32> to vector<16x8xf32>
    %113 = vector.extract_strided_slice %77 {offsets = [0, 48], sizes = [16, 8], strides = [1, 1]} : vector<16x96xf32> to vector<16x8xf32>
    %114 = vector.extract_strided_slice %77 {offsets = [0, 80], sizes = [16, 8], strides = [1, 1]} : vector<16x96xf32> to vector<16x8xf32>
    %cst_40 = arith.constant dense<0.000000e+00> : vector<16x16xf32>
    %115 = tpu.matmul %112, %113, %cst_40 {dimension_numbers = #tpu.dot_dimension_numbers<[1], [1], [0], [0], [0, 0, 1, 0], [], []>} : vector<16x8xf32>, vector<16x8xf32>, vector<16x16xf32> -> vector<16x16xf32>
    %116 = arith.addf %115, %7 : vector<16x16xf32>
    %cst_41 = arith.constant dense<0xFF800000> : vector<16xf32>
    %117 = vector.multi_reduction <maximumf>, %116, %cst_41 [1] : vector<16x16xf32> to vector<16xf32>
    %118 = vector.shape_cast %117 : vector<16xf32> to vector<16x1xf32>
    %119 = vector.broadcast %118 : vector<16x1xf32> to vector<16x16xf32>
    %120 = arith.subf %116, %119 : vector<16x16xf32>
    %121 = math.exp %120 : vector<16x16xf32>
    %cst_42 = arith.constant dense<0.000000e+00> : vector<16xf32>
    %122 = vector.multi_reduction <add>, %121, %cst_42 [1] : vector<16x16xf32> to vector<16xf32>
    %123 = vector.shape_cast %122 : vector<16xf32> to vector<16x1xf32>
    %124 = tpu.reciprocal %123 {approx = true} : vector<16x1xf32> -> vector<16x1xf32>
    %125 = vector.broadcast %124 : vector<16x1xf32> to vector<16x16xf32>
    %126 = arith.mulf %121, %125 : vector<16x16xf32>
    %cst_43 = arith.constant dense<0.000000e+00> : vector<16x8xf32>
    %127 = tpu.matmul %126, %114, %cst_43 {dimension_numbers = #tpu.dot_dimension_numbers<[1], [0], [0], [1], [0, 0, 1, 1], [], []>} : vector<16x16xf32>, vector<16x8xf32>, vector<16x8xf32> -> vector<16x8xf32>
    %c16_44 = arith.constant 16 : index
    %c16_45 = arith.constant 16 : index
    %128 = vector.load %arg8[%c16_44, %c16_45] : memref<64x32xf32, #tpu.memory_space<vmem>>, vector<16x8xf32>
    tpu.vector_store %arg8[%c16_44, %c16_45], %127 {strides = array<i32>} : memref<64x32xf32, #tpu.memory_space<vmem>>, vector<16x8xf32>,
    %129 = vector.extract_strided_slice %77 {offsets = [0, 24], sizes = [16, 8], strides = [1, 1]} : vector<16x96xf32> to vector<16x8xf32>
    %130 = vector.extract_strided_slice %77 {offsets = [0, 56], sizes = [16, 8], strides = [1, 1]} : vector<16x96xf32> to vector<16x8xf32>
    %131 = vector.extract_strided_slice %77 {offsets = [0, 88], sizes = [16, 8], strides = [1, 1]} : vector<16x96xf32> to vector<16x8xf32>
    %cst_46 = arith.constant dense<0.000000e+00> : vector<16x16xf32>
    %132 = tpu.matmul %129, %130, %cst_46 {dimension_numbers = #tpu.dot_dimension_numbers<[1], [1], [0], [0], [0, 0, 1, 0], [], []>} : vector<16x8xf32>, vector<16x8xf32>, vector<16x16xf32> -> vector<16x16xf32>
    %133 = arith.addf %132, %7 : vector<16x16xf32>
    %cst_47 = arith.constant dense<0xFF800000> : vector<16xf32>
    %134 = vector.multi_reduction <maximumf>, %133, %cst_47 [1] : vector<16x16xf32> to vector<16xf32>
    %135 = vector.shape_cast %134 : vector<16xf32> to vector<16x1xf32>
    %136 = vector.broadcast %135 : vector<16x1xf32> to vector<16x16xf32>
    %137 = arith.subf %133, %136 : vector<16x16xf32>
    %138 = math.exp %137 : vector<16x16xf32>
    %cst_48 = arith.constant dense<0.000000e+00> : vector<16xf32>
    %139 = vector.multi_reduction <add>, %138, %cst_48 [1] : vector<16x16xf32> to vector<16xf32>
    %140 = vector.shape_cast %139 : vector<16xf32> to vector<16x1xf32>
    %141 = tpu.reciprocal %140 {approx = true} : vector<16x1xf32> -> vector<16x1xf32>
    %142 = vector.broadcast %141 : vector<16x1xf32> to vector<16x16xf32>
    %143 = arith.mulf %138, %142 : vector<16x16xf32>
    %cst_49 = arith.constant dense<0.000000e+00> : vector<16x8xf32>
    %144 = tpu.matmul %143, %131, %cst_49 {dimension_numbers = #tpu.dot_dimension_numbers<[1], [0], [0], [1], [0, 0, 1, 1], [], []>} : vector<16x16xf32>, vector<16x8xf32>, vector<16x8xf32> -> vector<16x8xf32>
    %c16_50 = arith.constant 16 : index
    %c24_51 = arith.constant 24 : index
    %145 = vector.load %arg8[%c16_50, %c24_51] : memref<64x32xf32, #tpu.memory_space<vmem>>, vector<16x8xf32>
    tpu.vector_store %arg8[%c16_50, %c24_51], %144 {strides = array<i32>} : memref<64x32xf32, #tpu.memory_space<vmem>>, vector<16x8xf32>,
    %146 = vector.extract_strided_slice %5 {offsets = [32, 0], sizes = [16, 96], strides = [1, 1]} : vector<64x96xf32> to vector<16x96xf32>
    %147 = vector.extract_strided_slice %146 {offsets = [0, 0], sizes = [16, 8], strides = [1, 1]} : vector<16x96xf32> to vector<16x8xf32>
    %148 = vector.extract_strided_slice %146 {offsets = [0, 32], sizes = [16, 8], strides = [1, 1]} : vector<16x96xf32> to vector<16x8xf32>
    %149 = vector.extract_strided_slice %146 {offsets = [0, 64], sizes = [16, 8], strides = [1, 1]} : vector<16x96xf32> to vector<16x8xf32>
    %cst_52 = arith.constant dense<0.000000e+00> : vector<16x16xf32>
    %150 = tpu.matmul %147, %148, %cst_52 {dimension_numbers = #tpu.dot_dimension_numbers<[1], [1], [0], [0], [0, 0, 1, 0], [], []>} : vector<16x8xf32>, vector<16x8xf32>, vector<16x16xf32> -> vector<16x16xf32>
    %151 = arith.addf %150, %7 : vector<16x16xf32>
    %cst_53 = arith.constant dense<0xFF800000> : vector<16xf32>
    %152 = vector.multi_reduction <maximumf>, %151, %cst_53 [1] : vector<16x16xf32> to vector<16xf32>
    %153 = vector.shape_cast %152 : vector<16xf32> to vector<16x1xf32>
    %154 = vector.broadcast %153 : vector<16x1xf32> to vector<16x16xf32>
    %155 = arith.subf %151, %154 : vector<16x16xf32>
    %156 = math.exp %155 : vector<16x16xf32>
    %cst_54 = arith.constant dense<0.000000e+00> : vector<16xf32>
    %157 = vector.multi_reduction <add>, %156, %cst_54 [1] : vector<16x16xf32> to vector<16xf32>
    %158 = vector.shape_cast %157 : vector<16xf32> to vector<16x1xf32>
    %159 = tpu.reciprocal %158 {approx = true} : vector<16x1xf32> -> vector<16x1xf32>
    %160 = vector.broadcast %159 : vector<16x1xf32> to vector<16x16xf32>
    %161 = arith.mulf %156, %160 : vector<16x16xf32>
    %cst_55 = arith.constant dense<0.000000e+00> : vector<16x8xf32>
    %162 = tpu.matmul %161, %149, %cst_55 {dimension_numbers = #tpu.dot_dimension_numbers<[1], [0], [0], [1], [0, 0, 1, 1], [], []>} : vector<16x16xf32>, vector<16x8xf32>, vector<16x8xf32> -> vector<16x8xf32>
    %c32 = arith.constant 32 : index
    %c0_56 = arith.constant 0 : index
    %163 = vector.load %arg8[%c32, %c0_56] : memref<64x32xf32, #tpu.memory_space<vmem>>, vector<16x8xf32>
    tpu.vector_store %arg8[%c32, %c0_56], %162 {strides = array<i32>} : memref<64x32xf32, #tpu.memory_space<vmem>>, vector<16x8xf32>,
    %164 = vector.extract_strided_slice %146 {offsets = [0, 8], sizes = [16, 8], strides = [1, 1]} : vector<16x96xf32> to vector<16x8xf32>
    %165 = vector.extract_strided_slice %146 {offsets = [0, 40], sizes = [16, 8], strides = [1, 1]} : vector<16x96xf32> to vector<16x8xf32>
    %166 = vector.extract_strided_slice %146 {offsets = [0, 72], sizes = [16, 8], strides = [1, 1]} : vector<16x96xf32> to vector<16x8xf32>
    %cst_57 = arith.constant dense<0.000000e+00> : vector<16x16xf32>
    %167 = tpu.matmul %164, %165, %cst_57 {dimension_numbers = #tpu.dot_dimension_numbers<[1], [1], [0], [0], [0, 0, 1, 0], [], []>} : vector<16x8xf32>, vector<16x8xf32>, vector<16x16xf32> -> vector<16x16xf32>
    %168 = arith.addf %167, %7 : vector<16x16xf32>
    %cst_58 = arith.constant dense<0xFF800000> : vector<16xf32>
    %169 = vector.multi_reduction <maximumf>, %168, %cst_58 [1] : vector<16x16xf32> to vector<16xf32>
    %170 = vector.shape_cast %169 : vector<16xf32> to vector<16x1xf32>
    %171 = vector.broadcast %170 : vector<16x1xf32> to vector<16x16xf32>
    %172 = arith.subf %168, %171 : vector<16x16xf32>
    %173 = math.exp %172 : vector<16x16xf32>
    %cst_59 = arith.constant dense<0.000000e+00> : vector<16xf32>
    %174 = vector.multi_reduction <add>, %173, %cst_59 [1] : vector<16x16xf32> to vector<16xf32>
    %175 = vector.shape_cast %174 : vector<16xf32> to vector<16x1xf32>
    %176 = tpu.reciprocal %175 {approx = true} : vector<16x1xf32> -> vector<16x1xf32>
    %177 = vector.broadcast %176 : vector<16x1xf32> to vector<16x16xf32>
    %178 = arith.mulf %173, %177 : vector<16x16xf32>
    %cst_60 = arith.constant dense<0.000000e+00> : vector<16x8xf32>
    %179 = tpu.matmul %178, %166, %cst_60 {dimension_numbers = #tpu.dot_dimension_numbers<[1], [0], [0], [1], [0, 0, 1, 1], [], []>} : vector<16x16xf32>, vector<16x8xf32>, vector<16x8xf32> -> vector<16x8xf32>
    %c32_61 = arith.constant 32 : index
    %c8_62 = arith.constant 8 : index
    %180 = vector.load %arg8[%c32_61, %c8_62] : memref<64x32xf32, #tpu.memory_space<vmem>>, vector<16x8xf32>
    tpu.vector_store %arg8[%c32_61, %c8_62], %179 {strides = array<i32>} : memref<64x32xf32, #tpu.memory_space<vmem>>, vector<16x8xf32>,
    %181 = vector.extract_strided_slice %146 {offsets = [0, 16], sizes = [16, 8], strides = [1, 1]} : vector<16x96xf32> to vector<16x8xf32>
    %182 = vector.extract_strided_slice %146 {offsets = [0, 48], sizes = [16, 8], strides = [1, 1]} : vector<16x96xf32> to vector<16x8xf32>
    %183 = vector.extract_strided_slice %146 {offsets = [0, 80], sizes = [16, 8], strides = [1, 1]} : vector<16x96xf32> to vector<16x8xf32>
    %cst_63 = arith.constant dense<0.000000e+00> : vector<16x16xf32>
    %184 = tpu.matmul %181, %182, %cst_63 {dimension_numbers = #tpu.dot_dimension_numbers<[1], [1], [0], [0], [0, 0, 1, 0], [], []>} : vector<16x8xf32>, vector<16x8xf32>, vector<16x16xf32> -> vector<16x16xf32>
    %185 = arith.addf %184, %7 : vector<16x16xf32>
    %cst_64 = arith.constant dense<0xFF800000> : vector<16xf32>
    %186 = vector.multi_reduction <maximumf>, %185, %cst_64 [1] : vector<16x16xf32> to vector<16xf32>
    %187 = vector.shape_cast %186 : vector<16xf32> to vector<16x1xf32>
    %188 = vector.broadcast %187 : vector<16x1xf32> to vector<16x16xf32>
    %189 = arith.subf %185, %188 : vector<16x16xf32>
    %190 = math.exp %189 : vector<16x16xf32>
    %cst_65 = arith.constant dense<0.000000e+00> : vector<16xf32>
    %191 = vector.multi_reduction <add>, %190, %cst_65 [1] : vector<16x16xf32> to vector<16xf32>
    %192 = vector.shape_cast %191 : vector<16xf32> to vector<16x1xf32>
    %193 = tpu.reciprocal %192 {approx = true} : vector<16x1xf32> -> vector<16x1xf32>
    %194 = vector.broadcast %193 : vector<16x1xf32> to vector<16x16xf32>
    %195 = arith.mulf %190, %194 : vector<16x16xf32>
    %cst_66 = arith.constant dense<0.000000e+00> : vector<16x8xf32>
    %196 = tpu.matmul %195, %183, %cst_66 {dimension_numbers = #tpu.dot_dimension_numbers<[1], [0], [0], [1], [0, 0, 1, 1], [], []>} : vector<16x16xf32>, vector<16x8xf32>, vector<16x8xf32> -> vector<16x8xf32>
    %c32_67 = arith.constant 32 : index
    %c16_68 = arith.constant 16 : index
    %197 = vector.load %arg8[%c32_67, %c16_68] : memref<64x32xf32, #tpu.memory_space<vmem>>, vector<16x8xf32>
    tpu.vector_store %arg8[%c32_67, %c16_68], %196 {strides = array<i32>} : memref<64x32xf32, #tpu.memory_space<vmem>>, vector<16x8xf32>,
    %198 = vector.extract_strided_slice %146 {offsets = [0, 24], sizes = [16, 8], strides = [1, 1]} : vector<16x96xf32> to vector<16x8xf32>
    %199 = vector.extract_strided_slice %146 {offsets = [0, 56], sizes = [16, 8], strides = [1, 1]} : vector<16x96xf32> to vector<16x8xf32>
    %200 = vector.extract_strided_slice %146 {offsets = [0, 88], sizes = [16, 8], strides = [1, 1]} : vector<16x96xf32> to vector<16x8xf32>
    %cst_69 = arith.constant dense<0.000000e+00> : vector<16x16xf32>
    %201 = tpu.matmul %198, %199, %cst_69 {dimension_numbers = #tpu.dot_dimension_numbers<[1], [1], [0], [0], [0, 0, 1, 0], [], []>} : vector<16x8xf32>, vector<16x8xf32>, vector<16x16xf32> -> vector<16x16xf32>
    %202 = arith.addf %201, %7 : vector<16x16xf32>
    %cst_70 = arith.constant dense<0xFF800000> : vector<16xf32>
    %203 = vector.multi_reduction <maximumf>, %202, %cst_70 [1] : vector<16x16xf32> to vector<16xf32>
    %204 = vector.shape_cast %203 : vector<16xf32> to vector<16x1xf32>
    %205 = vector.broadcast %204 : vector<16x1xf32> to vector<16x16xf32>
    %206 = arith.subf %202, %205 : vector<16x16xf32>
    %207 = math.exp %206 : vector<16x16xf32>
    %cst_71 = arith.constant dense<0.000000e+00> : vector<16xf32>
    %208 = vector.multi_reduction <add>, %207, %cst_71 [1] : vector<16x16xf32> to vector<16xf32>
    %209 = vector.shape_cast %208 : vector<16xf32> to vector<16x1xf32>
    %210 = tpu.reciprocal %209 {approx = true} : vector<16x1xf32> -> vector<16x1xf32>
    %211 = vector.broadcast %210 : vector<16x1xf32> to vector<16x16xf32>
    %212 = arith.mulf %207, %211 : vector<16x16xf32>
    %cst_72 = arith.constant dense<0.000000e+00> : vector<16x8xf32>
    %213 = tpu.matmul %212, %200, %cst_72 {dimension_numbers = #tpu.dot_dimension_numbers<[1], [0], [0], [1], [0, 0, 1, 1], [], []>} : vector<16x16xf32>, vector<16x8xf32>, vector<16x8xf32> -> vector<16x8xf32>
    %c32_73 = arith.constant 32 : index
    %c24_74 = arith.constant 24 : index
    %214 = vector.load %arg8[%c32_73, %c24_74] : memref<64x32xf32, #tpu.memory_space<vmem>>, vector<16x8xf32>
    tpu.vector_store %arg8[%c32_73, %c24_74], %213 {strides = array<i32>} : memref<64x32xf32, #tpu.memory_space<vmem>>, vector<16x8xf32>,
    %215 = vector.extract_strided_slice %5 {offsets = [48, 0], sizes = [16, 96], strides = [1, 1]} : vector<64x96xf32> to vector<16x96xf32>
    %216 = vector.extract_strided_slice %215 {offsets = [0, 0], sizes = [16, 8], strides = [1, 1]} : vector<16x96xf32> to vector<16x8xf32>
    %217 = vector.extract_strided_slice %215 {offsets = [0, 32], sizes = [16, 8], strides = [1, 1]} : vector<16x96xf32> to vector<16x8xf32>
    %218 = vector.extract_strided_slice %215 {offsets = [0, 64], sizes = [16, 8], strides = [1, 1]} : vector<16x96xf32> to vector<16x8xf32>
    %cst_75 = arith.constant dense<0.000000e+00> : vector<16x16xf32>
    %219 = tpu.matmul %216, %217, %cst_75 {dimension_numbers = #tpu.dot_dimension_numbers<[1], [1], [0], [0], [0, 0, 1, 0], [], []>} : vector<16x8xf32>, vector<16x8xf32>, vector<16x16xf32> -> vector<16x16xf32>
    %220 = arith.addf %219, %7 : vector<16x16xf32>
    %cst_76 = arith.constant dense<0xFF800000> : vector<16xf32>
    %221 = vector.multi_reduction <maximumf>, %220, %cst_76 [1] : vector<16x16xf32> to vector<16xf32>
    %222 = vector.shape_cast %221 : vector<16xf32> to vector<16x1xf32>
    %223 = vector.broadcast %222 : vector<16x1xf32> to vector<16x16xf32>
    %224 = arith.subf %220, %223 : vector<16x16xf32>
    %225 = math.exp %224 : vector<16x16xf32>
    %cst_77 = arith.constant dense<0.000000e+00> : vector<16xf32>
    %226 = vector.multi_reduction <add>, %225, %cst_77 [1] : vector<16x16xf32> to vector<16xf32>
    %227 = vector.shape_cast %226 : vector<16xf32> to vector<16x1xf32>
    %228 = tpu.reciprocal %227 {approx = true} : vector<16x1xf32> -> vector<16x1xf32>
    %229 = vector.broadcast %228 : vector<16x1xf32> to vector<16x16xf32>
    %230 = arith.mulf %225, %229 : vector<16x16xf32>
    %cst_78 = arith.constant dense<0.000000e+00> : vector<16x8xf32>
    %231 = tpu.matmul %230, %218, %cst_78 {dimension_numbers = #tpu.dot_dimension_numbers<[1], [0], [0], [1], [0, 0, 1, 1], [], []>} : vector<16x16xf32>, vector<16x8xf32>, vector<16x8xf32> -> vector<16x8xf32>
    %c48 = arith.constant 48 : index
    %c0_79 = arith.constant 0 : index
    %232 = vector.load %arg8[%c48, %c0_79] : memref<64x32xf32, #tpu.memory_space<vmem>>, vector<16x8xf32>
    tpu.vector_store %arg8[%c48, %c0_79], %231 {strides = array<i32>} : memref<64x32xf32, #tpu.memory_space<vmem>>, vector<16x8xf32>,
    %233 = vector.extract_strided_slice %215 {offsets = [0, 8], sizes = [16, 8], strides = [1, 1]} : vector<16x96xf32> to vector<16x8xf32>
    %234 = vector.extract_strided_slice %215 {offsets = [0, 40], sizes = [16, 8], strides = [1, 1]} : vector<16x96xf32> to vector<16x8xf32>
    %235 = vector.extract_strided_slice %215 {offsets = [0, 72], sizes = [16, 8], strides = [1, 1]} : vector<16x96xf32> to vector<16x8xf32>
    %cst_80 = arith.constant dense<0.000000e+00> : vector<16x16xf32>
    %236 = tpu.matmul %233, %234, %cst_80 {dimension_numbers = #tpu.dot_dimension_numbers<[1], [1], [0], [0], [0, 0, 1, 0], [], []>} : vector<16x8xf32>, vector<16x8xf32>, vector<16x16xf32> -> vector<16x16xf32>
    %237 = arith.addf %236, %7 : vector<16x16xf32>
    %cst_81 = arith.constant dense<0xFF800000> : vector<16xf32>
    %238 = vector.multi_reduction <maximumf>, %237, %cst_81 [1] : vector<16x16xf32> to vector<16xf32>
    %239 = vector.shape_cast %238 : vector<16xf32> to vector<16x1xf32>
    %240 = vector.broadcast %239 : vector<16x1xf32> to vector<16x16xf32>
    %241 = arith.subf %237, %240 : vector<16x16xf32>
    %242 = math.exp %241 : vector<16x16xf32>
    %cst_82 = arith.constant dense<0.000000e+00> : vector<16xf32>
    %243 = vector.multi_reduction <add>, %242, %cst_82 [1] : vector<16x16xf32> to vector<16xf32>
    %244 = vector.shape_cast %243 : vector<16xf32> to vector<16x1xf32>
    %245 = tpu.reciprocal %244 {approx = true} : vector<16x1xf32> -> vector<16x1xf32>
    %246 = vector.broadcast %245 : vector<16x1xf32> to vector<16x16xf32>
    %247 = arith.mulf %242, %246 : vector<16x16xf32>
    %cst_83 = arith.constant dense<0.000000e+00> : vector<16x8xf32>
    %248 = tpu.matmul %247, %235, %cst_83 {dimension_numbers = #tpu.dot_dimension_numbers<[1], [0], [0], [1], [0, 0, 1, 1], [], []>} : vector<16x16xf32>, vector<16x8xf32>, vector<16x8xf32> -> vector<16x8xf32>
    %c48_84 = arith.constant 48 : index
    %c8_85 = arith.constant 8 : index
    %249 = vector.load %arg8[%c48_84, %c8_85] : memref<64x32xf32, #tpu.memory_space<vmem>>, vector<16x8xf32>
    tpu.vector_store %arg8[%c48_84, %c8_85], %248 {strides = array<i32>} : memref<64x32xf32, #tpu.memory_space<vmem>>, vector<16x8xf32>,
    %250 = vector.extract_strided_slice %215 {offsets = [0, 16], sizes = [16, 8], strides = [1, 1]} : vector<16x96xf32> to vector<16x8xf32>
    %251 = vector.extract_strided_slice %215 {offsets = [0, 48], sizes = [16, 8], strides = [1, 1]} : vector<16x96xf32> to vector<16x8xf32>
    %252 = vector.extract_strided_slice %215 {offsets = [0, 80], sizes = [16, 8], strides = [1, 1]} : vector<16x96xf32> to vector<16x8xf32>
    %cst_86 = arith.constant dense<0.000000e+00> : vector<16x16xf32>
    %253 = tpu.matmul %250, %251, %cst_86 {dimension_numbers = #tpu.dot_dimension_numbers<[1], [1], [0], [0], [0, 0, 1, 0], [], []>} : vector<16x8xf32>, vector<16x8xf32>, vector<16x16xf32> -> vector<16x16xf32>
    %254 = arith.addf %253, %7 : vector<16x16xf32>
    %cst_87 = arith.constant dense<0xFF800000> : vector<16xf32>
    %255 = vector.multi_reduction <maximumf>, %254, %cst_87 [1] : vector<16x16xf32> to vector<16xf32>
    %256 = vector.shape_cast %255 : vector<16xf32> to vector<16x1xf32>
    %257 = vector.broadcast %256 : vector<16x1xf32> to vector<16x16xf32>
    %258 = arith.subf %254, %257 : vector<16x16xf32>
    %259 = math.exp %258 : vector<16x16xf32>
    %cst_88 = arith.constant dense<0.000000e+00> : vector<16xf32>
    %260 = vector.multi_reduction <add>, %259, %cst_88 [1] : vector<16x16xf32> to vector<16xf32>
    %261 = vector.shape_cast %260 : vector<16xf32> to vector<16x1xf32>
    %262 = tpu.reciprocal %261 {approx = true} : vector<16x1xf32> -> vector<16x1xf32>
    %263 = vector.broadcast %262 : vector<16x1xf32> to vector<16x16xf32>
    %264 = arith.mulf %259, %263 : vector<16x16xf32>
    %cst_89 = arith.constant dense<0.000000e+00> : vector<16x8xf32>
    %265 = tpu.matmul %264, %252, %cst_89 {dimension_numbers = #tpu.dot_dimension_numbers<[1], [0], [0], [1], [0, 0, 1, 1], [], []>} : vector<16x16xf32>, vector<16x8xf32>, vector<16x8xf32> -> vector<16x8xf32>
    %c48_90 = arith.constant 48 : index
    %c16_91 = arith.constant 16 : index
    %266 = vector.load %arg8[%c48_90, %c16_91] : memref<64x32xf32, #tpu.memory_space<vmem>>, vector<16x8xf32>
    tpu.vector_store %arg8[%c48_90, %c16_91], %265 {strides = array<i32>} : memref<64x32xf32, #tpu.memory_space<vmem>>, vector<16x8xf32>,
    %267 = vector.extract_strided_slice %215 {offsets = [0, 24], sizes = [16, 8], strides = [1, 1]} : vector<16x96xf32> to vector<16x8xf32>
    %268 = vector.extract_strided_slice %215 {offsets = [0, 56], sizes = [16, 8], strides = [1, 1]} : vector<16x96xf32> to vector<16x8xf32>
    %269 = vector.extract_strided_slice %215 {offsets = [0, 88], sizes = [16, 8], strides = [1, 1]} : vector<16x96xf32> to vector<16x8xf32>
    %cst_92 = arith.constant dense<0.000000e+00> : vector<16x16xf32>
    %270 = tpu.matmul %267, %268, %cst_92 {dimension_numbers = #tpu.dot_dimension_numbers<[1], [1], [0], [0], [0, 0, 1, 0], [], []>} : vector<16x8xf32>, vector<16x8xf32>, vector<16x16xf32> -> vector<16x16xf32>
    %271 = arith.addf %270, %7 : vector<16x16xf32>
    %cst_93 = arith.constant dense<0xFF800000> : vector<16xf32>
    %272 = vector.multi_reduction <maximumf>, %271, %cst_93 [1] : vector<16x16xf32> to vector<16xf32>
    %273 = vector.shape_cast %272 : vector<16xf32> to vector<16x1xf32>
    %274 = vector.broadcast %273 : vector<16x1xf32> to vector<16x16xf32>
    %275 = arith.subf %271, %274 : vector<16x16xf32>
    %276 = math.exp %275 : vector<16x16xf32>
    %cst_94 = arith.constant dense<0.000000e+00> : vector<16xf32>
    %277 = vector.multi_reduction <add>, %276, %cst_94 [1] : vector<16x16xf32> to vector<16xf32>
    %278 = vector.shape_cast %277 : vector<16xf32> to vector<16x1xf32>
    %279 = tpu.reciprocal %278 {approx = true} : vector<16x1xf32> -> vector<16x1xf32>
    %280 = vector.broadcast %279 : vector<16x1xf32> to vector<16x16xf32>
    %281 = arith.mulf %276, %280 : vector<16x16xf32>
    %cst_95 = arith.constant dense<0.000000e+00> : vector<16x8xf32>
    %282 = tpu.matmul %281, %269, %cst_95 {dimension_numbers = #tpu.dot_dimension_numbers<[1], [0], [0], [1], [0, 0, 1, 1], [], []>} : vector<16x16xf32>, vector<16x8xf32>, vector<16x8xf32> -> vector<16x8xf32>
    %c48_96 = arith.constant 48 : index
    %c24_97 = arith.constant 24 : index
    %283 = vector.load %arg8[%c48_96, %c24_97] : memref<64x32xf32, #tpu.memory_space<vmem>>, vector<16x8xf32>
    tpu.vector_store %arg8[%c48_96, %c24_97], %282 {strides = array<i32>} : memref<64x32xf32, #tpu.memory_space<vmem>>, vector<16x8xf32>,
    %c0_98 = arith.constant 0 : index
    %c0_99 = arith.constant 0 : index
    %284 = vector.load %arg8[%c0_98, %c0_99] : memref<64x32xf32, #tpu.memory_space<vmem>>, vector<64x32xf32>
    %c0_100 = arith.constant 0 : index
    %c0_101 = arith.constant 0 : index
    %285 = vector.load %arg4[%c0_100, %c0_101] : memref<32x32xf32, #tpu.memory_space<vmem>>, vector<32x32xf32>
    %cst_102 = arith.constant dense<0.000000e+00> : vector<64x32xf32>
    %286 = tpu.matmul %284, %285, %cst_102 {dimension_numbers = #tpu.dot_dimension_numbers<[1], [0], [0], [1], [0, 0, 1, 1], [], []>} : vector<64x32xf32>, vector<32x32xf32>, vector<64x32xf32> -> vector<64x32xf32>
    %c0_103 = arith.constant 0 : index
    %c0_104 = arith.constant 0 : index
    %287 = vector.load %arg5[%c0_103, %c0_104] : memref<1x32xf32, #tpu.memory_space<vmem>>, vector<1x32xf32>
    %288 = vector.broadcast %287 : vector<1x32xf32> to vector<64x32xf32>
    %289 = arith.addf %286, %288 : vector<64x32xf32>
    %c0_105 = arith.constant 0 : index
    %c0_106 = arith.constant 0 : index
    %290 = vector.load %arg7[%c0_105, %c0_106] : memref<64x32xf32, #tpu.memory_space<vmem>>, vector<64x32xf32>
    tpu.vector_store %arg7[%c0_105, %c0_106], %289 {strides = array<i32>} : memref<64x32xf32, #tpu.memory_space<vmem>>, vector<64x32xf32>,
    return
  }
  func.func @transform_0(%arg0: i32) -> (i32, i32) {
    %c0_i32 = arith.constant 0 : i32
    %c0_i32_0 = arith.constant 0 : i32
    return %arg0, %c0_i32 : i32, i32
  }
  func.func @transform_1(%arg0: i32) -> (i32, i32) {
    %c0_i32 = arith.constant 0 : i32
    %c0_i32_0 = arith.constant 0 : i32
    %c0_i32_1 = arith.constant 0 : i32
    return %c0_i32, %c0_i32_0 : i32, i32
  }
  func.func @transform_2(%arg0: i32) -> (i32, i32) {
    %c0_i32 = arith.constant 0 : i32
    %c0_i32_0 = arith.constant 0 : i32
    %c0_i32_1 = arith.constant 0 : i32
    return %c0_i32, %c0_i32_0 : i32, i32
  }
  func.func @transform_3(%arg0: i32) -> (i32, i32) {
    %c0_i32 = arith.constant 0 : i32
    %c0_i32_0 = arith.constant 0 : i32
    %c0_i32_1 = arith.constant 0 : i32
    return %c0_i32, %c0_i32_0 : i32, i32
  }
  func.func @transform_4(%arg0: i32) -> (i32, i32) {
    %c0_i32 = arith.constant 0 : i32
    %c0_i32_0 = arith.constant 0 : i32
    %c0_i32_1 = arith.constant 0 : i32
    return %c0_i32, %c0_i32_0 : i32, i32
  }
  func.func @transform_5(%arg0: i32) -> (i32, i32) {
    %c0_i32 = arith.constant 0 : i32
    %c0_i32_0 = arith.constant 0 : i32
    %c0_i32_1 = arith.constant 0 : i32
    return %c0_i32, %c0_i32_0 : i32, i32
  }
  func.func @transform_6(%arg0: i32) -> (i32, i32) {
    %c0_i32 = arith.constant 0 : i32
    %c0_i32_0 = arith.constant 0 : i32
    return %arg0, %c0_i32 : i32, i32
  }
}

</mosaic_0001>

<bundles_post_ra>
// kernel: tpu_custom_call.1
= control target key start
LH: loop header
LB: loop body
LE: loop exit
PB: predicated region body
PF: predicated region fallthrough
CT: control target
= control target key end

     0   :  { %s5034_s21 = smov 0   ;;  %s5644_s0 = inlined_call_operand.vmem [shape: f32[128,32], index: 0, kind: input, shape index: {}]   ;;  %s5645_s1 = inlined_call_operand.vmem [shape: f32[32,96], index: 1, kind: input, shape index: {}]   ;;  %s5646_s2 = inlined_call_operand.vmem [shape: f32[1,96], index: 2, kind: input, shape index: {}]   ;;  %s5647_s3 = inlined_call_operand.vmem [shape: f32[32,32], index: 3, kind: input, shape index: {}]   ;;  %s5648_s4 = inlined_call_operand.vmem [shape: f32[1,32], index: 4, kind: input, shape index: {}]   ;;  %s5649_s5 = inlined_call_operand.vmem [shape: bf16[16,16], index: 5, kind: input, shape index: {}]   ;;  %s5650_s6 = inlined_call_operand.vmem [shape: f32[128,32], index: 6, kind: output, shape index: {}]  }
   0x1 LB: > { %s3945_s22 = sadd.s32 4294967295, %s4983_s21   ;;  %p3949_p0 = scmp.ge.s32.totalorder %s4983_s21, 1  ;;  %s4983_s21 = sphi %s5034_s21, %s16_s21  }
   0x2   : > { %p213_p1 = scmp.lt.s32.totalorder %s4983_s21, 3 }
   0x4   : > { %p214_p2 = pnand %p3949_p0, %p213_p1 }
   0x5   : > { %v263_v0 = vld [vmem:[%s5645_s1] sm:$0xff] (!%p214_p2)  ;;  %v264_v1 = vld [vmem:[%s5645_s1 + $0x8] sm:$0xff] (!%p214_p2)  ;;  %v265_v2 = vld [vmem:[%s5645_s1 + $0x10] sm:$0xff] (!%p214_p2)  ;;  %s3950_s29 = sshll.u32 (!%p214_p2), %s3945_s22, 3  ;;  %vm274_vm0 = vcmask (!%p214_p2), 261120   ;;  %vm414_vm1 = vcmask (!%p214_p2), 64512  }
   0x6   : > { %217 = sbr.rel (%p214_p2) target bundleno = 9069 (0x236d), region = 44  ;;  %v4490_v3 = vpack.c.bf16 (!%p214_p2), %v264_v1, %v263_v0  ;;  %v266_v4 = vld [vmem:[%s5645_s1 + $0x18] sm:$0xff] (!%p214_p2)  ;;  %p244_p3 = scmp.lt.s32.totalorder (!%p214_p2), %s3950_s29, 15  ;;  %v5073_v14 = vld [vmem:[%s5646_s2] ss:$0 sm:$0xff] (!%p214_p2)  ;;  %vm5103_vm2 = vmpackc.low (!%p214_p2), %vm414_vm1, %vm414_vm1  ;;  %vm498_vm3 = vcmask (!%p214_p2), 130048  }
   0x7   : > { %v4494_v5 = vpack.c.bf16 (!%p214_p2), %v266_v4, %v265_v2  ;;  %s4985_s14 = smov (!%p214_p2), 96   ;;  %v4071_v31 = vld [vmem:[%s5649_s5] sm:$0xff] (!%p214_p2)   ;;  %s4986_s17 = smov (!%p214_p2), 64   ;;  %vm818_vm4 = vcmask (!%p214_p2), 130112   ;;  %vm1029_vm5 = vcmask (!%p214_p2), 195712   ;;  %vm1240_vm6 = vcmask (!%p214_p2), 261312  }
   0x8   : > { %4491 = vmatprep.subr.bf16.mxu0 (!%p214_p2), %v4490_v3  ;;  %v5116_v32 = vunpack.c.h.bf16 (!%p214_p2), %v4071_v31  ;;  %v5118_v33 = vunpack.c.l.bf16 (!%p214_p2), %v4071_v31  ;;  %s4987_s18 = smov (!%p214_p2), 88   ;;  %s4988_s19 = smov (!%p214_p2), 80  }
   0x9   : > { %4493 = vmatpush3.bf16.msra.mxu0 (!%p214_p2), %v4490_v3  ;;  %s4989_s20 = smov (!%p214_p2), 120   ;;  %s4990_s22 = smov (!%p214_p2), 112  }
   0xa   : > { %4495 = vmatprep.subr.bf16.mxu0 (!%p214_p2), %v4494_v5  ;;  %s4991_s23 = smov (!%p214_p2), 56   ;;  %s4992_s24 = smov (!%p214_p2), 72  }
   0xb   : > { %s4993_s25 = smov (!%p214_p2), 48   ;;  %s4994_s26 = smov (!%p214_p2), 104  }
   0xc   : > { %s4995_s27 = smov (!%p214_p2), 40   ;;  %s4996_s7 = smov (!%p214_p2), 8  }
   0xd   : > { %s5654_s29 = smov (!%p244_p3, %s3950_s29), 15  ;;  %4497 = vmatpush3.bf16.msra.mxu0 %v4494_v5  ;;  %s4997_s9 = smov 16  }
   0xe   : > { %s3951_s8 = sshll.u32 %s5654_s29, 3  ;;  %s4998_s10 = smov 24  }
   0xf   : > { %s247_s11 = scalar_lea.vmem %s5644_s0, %s3951_s8 }
  0x10   : > { %v255_v6 = vld [vmem:[%s247_s11] sm:$0xff]  ;;  %v256_v7 = vld [vmem:[%s247_s11 + $0x8] sm:$0xff]  ;;  %v257_v8 = vld [vmem:[%s247_s11 + $0x10] sm:$0xff] }
  0x11   : > { %4234 = vmatprep.mubr.msk.f32.mxu0 %vm274_vm0, %v255_v6  ;;  %v258_v9 = vld [vmem:[%s247_s11 + $0x18] sm:$0xff]  ;;  %v259_v10 = vld [vmem:[%s247_s11 + $0x20] sm:$0xff]  ;;  %v260_v11 = vld [vmem:[%s247_s11 + $0x28] sm:$0xff] }
  0x12   : > { %4235 = vmatmul.mubr.msk.f32.vlgmr.msra.gmra.mrb[0].mxu0 %vm274_vm0, %v256_v7  ;;  %v261_v12 = vld [vmem:[%s247_s11 + $0x30] sm:$0xff]  ;;  %v262_v13 = vld [vmem:[%s247_s11 + $0x38] sm:$0xff] }
  0x13   : > { %4237 = vmatprep.mubr.msk.f32.mxu0 %vm274_vm0, %v257_v8 }
  0x16   : > { %4238 = vmatmul.mubr.msk.f32.gmra.mrb[2].mxu0 %vm274_vm0, %v258_v9 }
  0x17   : > { %4240 = vmatprep.mubr.msk.f32.mxu0 %vm274_vm0, %v259_v10 }
  0x1a   : > { %4241 = vmatmul.mubr.msk.f32.gmra.mrb[4].mxu0 %vm274_vm0, %v260_v11 }
  0x1b   : > { %4243 = vmatprep.mubr.msk.f32.mxu0 %vm274_vm0, %v261_v12 }
  0x1e   : > { %4244 = vmatmul.mubr.msk.f32.gmra.mrb[6].mxu0 %vm274_vm0, %v262_v13 }
  0xe5   : > { %v4236_v15 = vpop.f32.mrb[0].mxu0 }
  0xe6   : > { %v5076_v16 = vadd.f32 %v4236_v15, %v5073_v14  ;;  %v365_v17 = vpop.f32.mrb[1].mxu0 }
  0xe7   : > { %v5079_v18 = vadd.f32 %v5073_v14, %v365_v17 }
  0xe9   : > { %4250 = vmatprep.mubr.msk.f32.mxu0 %vm414_vm1, %v5079_v18  ;;  %v5085_v19 = vpack.i.bf16 %v5076_v16, %v5079_v18  ;;  %v5087_v20 = vpop.f32.mrb[2].mxu0 }
  0xea   : > { %v5091_v21 = vpop.f32.mrb[3].mxu0 }
  0xeb   : > { %4689 = vrot.lane.b32.xlu0 %v5085_v19, %s4985_s14 }
  0xed   : > { %v5093_v22 = vpop.f32.mrb[4].mxu0 }
  0xee   : > { %v5095_v23 = vpop.f32.mrb[5].mxu0 }
  0xf1   : > { %v5097_v24 = vpop.f32.mrb[6].mxu0 }
  0xf2   : > { %v5099_v25 = vpop.f32.mrb[7].mxu0 }
 0x15d   : > { %v4690_v26 = vpop.permute.xlu0 %4689 }
 0x15e   : > { %v4692_v27 = vunpack.i.h.bf16 %v4690_v26  ;;  %v4691_v28 = vunpack.i.l.bf16 %v4690_v26 }
 0x160   : > { %v4498_v30 = vpack.c.bf16 %v4692_v27, %v4691_v28 }
 0x162   : > { %4500 = vmatprep.subr.msk.bf16.mxu0 %vm5103_vm2, %v4498_v30 }
 0x163   : > { %4503 = vmatpush3.bf16.xpose.msk.msra.mxu0 %vm5103_vm2, %v4498_v30 }
 0x16a   : > { %4251 = vmatmul.mubr.msk.f32.vlgmr.msra.gmra.mrb[8].mxu0 %vm414_vm1, %v5076_v16 }
 0x23d   : > { %v4252_v34 = vpop.f32.mrb[8].mxu0 }
 0x23e   : > { %v495_v35 = vadd.f32 %v4252_v34, %v5116_v32  ;;  %v489_v36 = vpop.f32.mrb[9].mxu0 }
 0x23f   : > { %v490_v37 = vadd.f32 %v5118_v33, %v489_v36 }
 0x240   : > { %v502_v38 = vsel %vm498_vm3, %v495_v35, -inf }
 0x241   : > { %503 = vmax.xlane.f32.xlu1 %v502_v38  ;;  %v499_v39 = vsel %vm498_vm3, %v490_v37, -inf }
 0x242   : > { %500 = vmax.xlane.f32.xlu0 %v499_v39 }
 0x252   : > { %4694 = vrot.lane.b32.xlu1 %v5085_v19, %s4986_s17 }
 0x256   : > { %4699 = vrot.lane.b32.xlu1 %v5085_v19, %s4987_s18 }
 0x258   : > { %4704 = vrot.lane.b32.xlu0 %v5085_v19, %s4988_s19 }
 0x25a   : > { %610 = vrot.lane.b32.xlu1 %v5079_v18, %s4989_s20 }
 0x2ce   : > { %v504_v40 = vpop.xlane.xlu1 %503 }
 0x2cf   : > { %v506_v41 = vsub.f32 %v495_v35, %v504_v40  ;;  %v501_v42 = vpop.xlane.xlu0 %500 }
 0x2d0   : > { %v505_v43 = vsub.f32 %v490_v37, %v501_v42 }
 0x2d1   : > { %v509_v44 = vmul.f32 1.442695, %v506_v41 }
 0x2d2   : > { %v507_v45 = vmul.f32 1.442695, %v505_v43  ;;  %v4695_v46 = vpop.permute.xlu1 %4694 }
 0x2d3   : > { %4848 = vpow2.f32 %v509_v44  ;;  %v4697_v47 = vunpack.i.h.bf16 %v4695_v46  ;;  %v4696_v48 = vunpack.i.l.bf16 %v4695_v46  ;;  %v4705_v61 = vpop.permute.xlu0 %4704 }
 0x2d4   : > { %4850 = vpow2.f32 %v507_v45  ;;  %v4707_v0 = vunpack.i.h.bf16 %v4705_v61  ;;  %v4706_v1 = vunpack.i.l.bf16 %v4705_v61 }
 0x2d5   : > { %v4504_v49 = vpack.c.bf16 %v4697_v47, %v4696_v48 }
 0x2d6   : > { %v4700_v50 = vpop.permute.xlu1 %4699  ;;  %v4518_v4 = vpack.c.bf16 %v4707_v0, %v4706_v1 }
 0x2d7   : > { %v4702_v51 = vunpack.i.h.bf16 %v4700_v50  ;;  %v4701_v52 = vunpack.i.l.bf16 %v4700_v50  ;;  %4505 = vmatprep.subr.bf16.mxu1 %v4504_v49 }
 0x2d8   : > { %4507 = vmatpush3.bf16.msra.mxu1 %v4504_v49 }
 0x2d9   : > { %v4508_v53 = vpack.c.bf16 %v4702_v51, %v4701_v52 }
 0x2da   : > { %v611_v58 = vpop.permute.xlu1 %610 }
 0x2db   : > { %4510 = vmatprep.subr.msk.bf16.mxu1 %vm5103_vm2, %v4508_v53 }
 0x2dd   : > { %v4849_v54 = vpop.eup %4848 }
 0x2de   : > { %v514_v55 = vsel %vm498_vm3, %v4849_v54, 0.0  ;;  %v4851_v56 = vpop.eup %4850 }
 0x2df   : > { %515 = vadd.xlane.f32.xlu1 %v514_v55  ;;  %v511_v57 = vsel %vm498_vm3, %v4851_v56, 0.0 }
 0x2e3   : > { %512 = vadd.xlane.f32.xlu1 %v511_v57 }
 0x2f4   : > { %612 = vrot.lane.b32.xlu1 %v5076_v16, %s4989_s20 }
 0x2f8   : > { %821 = vrot.lane.b32.xlu1 %v5079_v18, %s4990_s22 }
 0x2fc   : > { %823 = vrot.lane.b32.xlu1 %v5076_v16, %s4990_s22 }
 0x36c   : > { %v516_v59 = vpop.xlane.xlu1 %515 }
 0x36d   : > { %4852 = vrcp.f32 %v516_v59 }
 0x370   : > { %v513_v60 = vpop.xlane.xlu1 %512 }
 0x371   : > { %4854 = vrcp.f32 %v513_v60 }
 0x374   : > { %v613_v5 = vpop.permute.xlu1 %612 }
 0x377   : > { %v4853_v62 = vpop.eup %4852 }
 0x378   : > { %v520_v3 = vmul.f32 %v4853_v62, %v4849_v54  ;;  %v822_v6 = vpop.permute.xlu1 %821 }
 0x37b   : > { %v4855_v63 = vpop.eup %4854 }
 0x37c   : > { %v519_v2 = vmul.f32 %v4855_v63, %v4851_v56  ;;  %v824_v7 = vpop.permute.xlu1 %823 }
 0x37e   : > { %4257 = vmatprep.mubr.msk.f32.mxu1 %vm498_vm3, %v519_v2 }
 0x37f   : > { %4258 = vmatmul.mubr.msk.f32.vlgmr.msra.gmra.mrb[0].mxu1 %vm498_vm3, %v520_v3 }
 0x380   : > { %4513 = vmatpush3.bf16.xpose.msk.msra.mxu1 %vm5103_vm2, %v4508_v53  ;;  %4264 = vmatprep.mubr.msk.f32.mxu1 %vm414_vm1, %v611_v58 }
 0x381   : > { %4520 = vmatprep.subr.msk.bf16.mxu1 %vm5103_vm2, %v4518_v4 }
 0x387   : > { %4265 = vmatmul.mubr.msk.f32.vlgmr.msra.gmra.mrb[2].mxu1 %vm414_vm1, %v613_v5 }
 0x388   : > { %4523 = vmatpush3.bf16.xpose.msk.msra.mxu1 %vm5103_vm2, %v4518_v4  ;;  %4278 = vmatprep.mubr.msk.f32.mxu1 %vm414_vm1, %v822_v6 }
 0x38f   : > { %4279 = vmatmul.mubr.msk.f32.vlgmr.msra.gmra.mrb[4].mxu1 %vm414_vm1, %v824_v7 }
 0x452   : > { %v4259_v8 = vpop.f32.mrb[0].mxu1 }
 0x453   : > { %609 = vst.msk [vmem:[#allocation2 + $0x8] sm:$0xff] %vm414_vm1, %v4259_v8  ;;  %v599_v9 = vpop.f32.mrb[1].mxu1 }
 0x454   : > { %608 = vst.msk [vmem:[#allocation2] sm:$0xff] %vm414_vm1, %v599_v9 }
 0x45a   : > { %v4266_v10 = vpop.f32.mrb[2].mxu1 }
 0x45b   : > { %v698_v11 = vadd.f32 %v4266_v10, %v5116_v32  ;;  %v692_v12 = vpop.f32.mrb[3].mxu1 }
 0x45c   : > { %v693_v13 = vadd.f32 %v5118_v33, %v692_v12 }
 0x45d   : > { %v704_v15 = vsel %vm498_vm3, %v698_v11, -inf }
 0x45e   : > { %705 = vmax.xlane.f32.xlu0 %v704_v15  ;;  %v701_v17 = vsel %vm498_vm3, %v693_v13, -inf }
 0x45f   : > { %702 = vmax.xlane.f32.xlu1 %v701_v17 }
 0x462   : > { %v4280_v26 = vpop.f32.mrb[4].mxu1 }
 0x463   : > { %v909_v27 = vadd.f32 %v4280_v26, %v5116_v32  ;;  %v903_v28 = vpop.f32.mrb[5].mxu1 }
 0x464   : > { %v904_v30 = vadd.f32 %v5118_v33, %v903_v28 }
 0x465   : > { %v915_v31 = vsel %vm498_vm3, %v909_v27, -inf }
 0x466   : > { %916 = vmax.xlane.f32.xlu0 %v915_v31  ;;  %v912_v34 = vsel %vm498_vm3, %v904_v30, -inf }
 0x467   : > { %913 = vmax.xlane.f32.xlu1 %v912_v34 }
 0x478   : > { %4709 = vrot.lane.b32.xlu1 %v5085_v19, %s4991_s23 }
 0x4eb   : > { %v706_v35 = vpop.xlane.xlu0 %705 }
 0x4ec   : > { %v708_v36 = vsub.f32 %v698_v11, %v706_v35  ;;  %v703_v37 = vpop.xlane.xlu1 %702 }
 0x4ed   : > { %v707_v38 = vsub.f32 %v693_v13, %v703_v37 }
 0x4ee   : > { %v711_v39 = vmul.f32 1.442695, %v708_v36 }
 0x4ef   : > { %v709_v40 = vmul.f32 1.442695, %v707_v38 }
 0x4f0   : > { %4856 = vpow2.f32 %v711_v39 }
 0x4f1   : > { %4858 = vpow2.f32 %v709_v40 }
 0x4f3   : > { %v917_v41 = vpop.xlane.xlu0 %916 }
 0x4f4   : > { %v919_v42 = vsub.f32 %v909_v27, %v917_v41  ;;  %v914_v43 = vpop.xlane.xlu1 %913 }
 0x4f5   : > { %v918_v55 = vsub.f32 %v904_v30, %v914_v43 }
 0x4f6   : > { %v922_v44 = vmul.f32 1.442695, %v919_v42 }
 0x4f7   : > { %v920_v56 = vmul.f32 1.442695, %v918_v55 }
 0x4f8   : > { %4860 = vpow2.f32 %v922_v44  ;;  %v4710_v45 = vpop.permute.xlu1 %4709 }
 0x4f9   : > { %v4712_v46 = vunpack.i.h.bf16 %v4710_v45  ;;  %v4711_v47 = vunpack.i.l.bf16 %v4710_v45  ;;  %4862 = vpow2.f32 %v920_v56 }
 0x4fa   : > { %v4857_v48 = vpop.eup %4856 }
 0x4fb   : > { %v4859_v49 = vpop.eup %4858  ;;  %v716_v50 = vsel %vm498_vm3, %v4857_v48, 0.0  ;;  %v4514_v51 = vpack.c.bf16 %v4712_v46, %v4711_v47 }
 0x4fc   : > { %717 = vadd.xlane.f32.xlu0 %v716_v50  ;;  %v713_v52 = vsel %vm498_vm3, %v4859_v49, 0.0 }
 0x4fd   : > { %714 = vadd.xlane.f32.xlu1 %v713_v52  ;;  %4515 = vmatprep.subr.bf16.mxu0 %v4514_v51 }
 0x4fe   : > { %4517 = vmatpush3.bf16.msra.mxu0 %v4514_v51 }
 0x502   : > { %v4861_v53 = vpop.eup %4860 }
 0x503   : > { %v927_v54 = vsel %vm498_vm3, %v4861_v53, 0.0  ;;  %v4863_v57 = vpop.eup %4862 }
 0x504   : > { %928 = vadd.xlane.f32.xlu0 %v927_v54  ;;  %v924_v58 = vsel %vm498_vm3, %v4863_v57, 0.0 }
 0x50e   : > { %4719 = vrot.lane.b32.xlu1 %v5085_v19, %s4992_s24 }
 0x51a   : > { %4714 = vrot.lane.b32.xlu0 %v5085_v19, %s4993_s25 }
 0x51e   : > { %1034 = vrot.lane.b32.xlu0 %v5076_v16, %s4994_s26 }
 0x532   : > { %925 = vadd.xlane.f32.xlu1 %v924_v58 }
 0x543   : > { %1032 = vrot.lane.b32.xlu1 %v5079_v18, %s4994_s26 }
 0x589   : > { %v718_v59 = vpop.xlane.xlu0 %717 }
 0x58a   : > { %4864 = vrcp.f32 %v718_v59  ;;  %v715_v60 = vpop.xlane.xlu1 %714 }
 0x58b   : > { %4866 = vrcp.f32 %v715_v60 }
 0x58e   : > { %v4720_v62 = vpop.permute.xlu1 %4719 }
 0x58f   : > { %v4722_v1 = vunpack.i.h.bf16 %v4720_v62  ;;  %v4721_v16 = vunpack.i.l.bf16 %v4720_v62 }
 0x591   : > { %v929_v61 = vpop.xlane.xlu0 %928  ;;  %v4528_v18 = vpack.c.bf16 %v4722_v1, %v4721_v16 }
 0x592   : > { %4868 = vrcp.f32 %v929_v61 }
 0x594   : > { %v4865_v63 = vpop.eup %4864 }
 0x595   : > { %v4867_v0 = vpop.eup %4866  ;;  %v4715_v2 = vpop.permute.xlu0 %4714  ;;  %v722_v6 = vmul.f32 %v4865_v63, %v4857_v48  ;;  %v5204_v48 = vadd.f32 %v5087_v20, %v5073_v14 }
 0x596   : > { %v4717_v3 = vunpack.i.h.bf16 %v4715_v2  ;;  %v4716_v4 = vunpack.i.l.bf16 %v4715_v2  ;;  %v721_v5 = vmul.f32 %v4867_v0, %v4859_v49  ;;  %v5208_v49 = vadd.f32 %v5073_v14, %v5091_v21 }
 0x598   : > { %4271 = vmatprep.mubr.msk.f32.mxu0 %vm498_vm3, %v721_v5  ;;  %v4524_v7 = vpack.c.bf16 %v4717_v3, %v4716_v4  ;;  %v5212_v50 = vpack.i.bf16 %v5204_v48, %v5208_v49 }
 0x599   : > { %4272 = vmatmul.mubr.msk.f32.vlgmr.msra.gmra.mrb[10].mxu0 %vm498_vm3, %v722_v6  ;;  %v1035_v15 = vpop.permute.xlu0 %1034 }
 0x59a   : > { %4525 = vmatprep.subr.bf16.mxu0 %v4524_v7 }
 0x59b   : > { %4527 = vmatpush3.bf16.msra.mxu0 %v4524_v7 }
 0x59c   : > { %4530 = vmatprep.subr.msk.bf16.mxu0 %vm5103_vm2, %v4528_v18  ;;  %v4869_v9 = vpop.eup %4868 }
 0x59d   : > { %v933_v12 = vmul.f32 %v4869_v9, %v4861_v53 }
 0x5bf   : > { %v926_v8 = vpop.xlane.xlu1 %925 }
 0x5c0   : > { %4870 = vrcp.f32 %v926_v8 }
 0x5c3   : > { %v1033_v13 = vpop.permute.xlu1 %1032 }
 0x5ca   : > { %v4871_v10 = vpop.eup %4870 }
 0x5cb   : > { %v932_v11 = vmul.f32 %v4871_v10, %v4863_v57 }
 0x5cd   : > { %4285 = vmatprep.mubr.msk.f32.mxu0 %vm498_vm3, %v932_v11 }
 0x5ce   : > { %4286 = vmatmul.mubr.msk.f32.vlgmr.msra.gmra.mrb[12].mxu0 %vm498_vm3, %v933_v12 }
 0x5cf   : > { %4533 = vmatpush3.bf16.xpose.msk.msra.mxu0 %vm5103_vm2, %v4528_v18  ;;  %4292 = vmatprep.mubr.msk.f32.mxu0 %vm414_vm1, %v1033_v13 }
 0x5d6   : > { %4293 = vmatmul.mubr.msk.f32.vlgmr.msra.gmra.mrb[14].mxu0 %vm414_vm1, %v1035_v15 }
 0x66c   : > { %v5188_v17 = vpop.f32.mrb[10].mxu0 }
 0x66d   : > { %v5190_v26 = vpop.f32.mrb[11].mxu0 }
 0x6a1   : > { %v5192_v27 = vpop.f32.mrb[12].mxu0 }
 0x6a2   : > { %v5194_v28 = vpop.f32.mrb[13].mxu0 }
 0x6a9   : > { %v4294_v30 = vpop.f32.mrb[14].mxu0 }
 0x6aa   : > { %v1120_v31 = vadd.f32 %v4294_v30, %v5116_v32  ;;  %v1114_v34 = vpop.f32.mrb[15].mxu0 }
 0x6ab   : > { %v1115_v35 = vadd.f32 %v5118_v33, %v1114_v34 }
 0x6ac   : > { %v1126_v36 = vsel %vm498_vm3, %v1120_v31, -inf }
 0x6ad   : > { %1127 = vmax.xlane.f32.xlu0 %v1126_v36  ;;  %v1123_v37 = vsel %vm498_vm3, %v1115_v35, -inf }
 0x6ae   : > { %1124 = vmax.xlane.f32.xlu1 %v1123_v37 }
 0x73a   : > { %v1128_v38 = vpop.xlane.xlu0 %1127 }
 0x73b   : > { %v1130_v39 = vsub.f32 %v1120_v31, %v1128_v38  ;;  %v1125_v40 = vpop.xlane.xlu1 %1124 }
 0x73c   : > { %v1129_v41 = vsub.f32 %v1115_v35, %v1125_v40 }
 0x73d   : > { %v1133_v42 = vmul.f32 1.442695, %v1130_v39 }
 0x73e   : > { %v1131_v43 = vmul.f32 1.442695, %v1129_v41 }
 0x73f   : > { %4872 = vpow2.f32 %v1133_v42 }
 0x740   : > { %4874 = vpow2.f32 %v1131_v43 }
 0x749   : > { %v4873_v44 = vpop.eup %4872 }
 0x74a   : > { %v4875_v45 = vpop.eup %4874  ;;  %v1138_v46 = vsel %vm498_vm3, %v4873_v44, 0.0 }
 0x74b   : > { %1139 = vadd.xlane.f32.xlu1 %v1138_v46  ;;  %v1135_v47 = vsel %vm498_vm3, %v4875_v45, 0.0 }
 0x74c   : > { %1136 = vadd.xlane.f32.xlu0 %v1135_v47 }
 0x75c   : > { %4729 = vrot.lane.b32.xlu1 %v5212_v50, %s4985_s14 }
 0x762   : > { %4724 = vrot.lane.b32.xlu0 %v5085_v19, %s4995_s27 }
 0x7d8   : > { %v1140_v51 = vpop.xlane.xlu1 %1139 }
 0x7d9   : > { %4876 = vrcp.f32 %v1140_v51  ;;  %v1137_v52 = vpop.xlane.xlu0 %1136 }
 0x7da   : > { %4878 = vrcp.f32 %v1137_v52 }
 0x7dc   : > { %v4730_v20 = vpop.permute.xlu1 %4729 }
 0x7dd   : > { %v4725_v53 = vpop.permute.xlu0 %4724  ;;  %v4732_v54 = vunpack.i.h.bf16 %v4730_v20  ;;  %v4731_v21 = vunpack.i.l.bf16 %v4730_v20 }
 0x7de   : > { %v4727_v55 = vunpack.i.h.bf16 %v4725_v53  ;;  %v4726_v56 = vunpack.i.l.bf16 %v4725_v53 }
 0x7df   : > { %v4538_v58 = vpack.c.bf16 %v4732_v54, %v4731_v21 }
 0x7e0   : > { %v4534_v57 = vpack.c.bf16 %v4727_v55, %v4726_v56 }
 0x7e2   : > { %4535 = vmatprep.subr.bf16.mxu1 %v4534_v57 }
 0x7e3   : > { %v4877_v59 = vpop.eup %4876  ;;  %4537 = vmatpush3.bf16.msra.mxu1 %v4534_v57 }
 0x7e4   : > { %v4879_v60 = vpop.eup %4878  ;;  %4540 = vmatprep.subr.msk.bf16.mxu1 %vm5103_vm2, %v4538_v58  ;;  %v1144_v61 = vmul.f32 %v4877_v59, %v4873_v44 }
 0x7e5   : > { %v1143_v19 = vmul.f32 %v4879_v60, %v4875_v45 }
 0x7e7   : > { %4299 = vmatprep.mubr.msk.f32.mxu1 %vm498_vm3, %v1143_v19 }
 0x7e8   : > { %4300 = vmatmul.mubr.msk.f32.vlgmr.msra.gmra.mrb[6].mxu1 %vm498_vm3, %v1144_v61 }
 0x7e9   : > { %4306 = vmatprep.mubr.msk.f32.mxu1 %vm414_vm1, %v5208_v49 }
 0x7ec   : > { %4543 = vmatpush3.bf16.xpose.msk.msra.mxu1 %vm5103_vm2, %v4538_v58 }
 0x7f3   : > { %4307 = vmatmul.mubr.msk.f32.vlgmr.msra.gmra.mrb[8].mxu1 %vm414_vm1, %v5204_v48 }
 0x8bb   : > { %v5228_v62 = vpop.f32.mrb[6].mxu1 }
 0x8bc   : > { %v5230_v63 = vpop.f32.mrb[7].mxu1 }
 0x8c6   : > { %v4308_v0 = vpop.f32.mrb[8].mxu1 }
 0x8c7   : > { %v1329_v1 = vadd.f32 %v4308_v0, %v5116_v32  ;;  %v1323_v2 = vpop.f32.mrb[9].mxu1 }
 0x8c8   : > { %v1324_v16 = vadd.f32 %v5118_v33, %v1323_v2 }
 0x8c9   : > { %v1335_v3 = vsel %vm498_vm3, %v1329_v1, -inf }
 0x8ca   : > { %1336 = vmax.xlane.f32.xlu0 %v1335_v3  ;;  %v1332_v4 = vsel %vm498_vm3, %v1324_v16, -inf }
 0x8cb   : > { %1333 = vmax.xlane.f32.xlu1 %v1332_v4 }
 0x957   : > { %v1337_v5 = vpop.xlane.xlu0 %1336 }
 0x958   : > { %v1339_v6 = vsub.f32 %v1329_v1, %v1337_v5  ;;  %v1334_v7 = vpop.xlane.xlu1 %1333 }
 0x959   : > { %v1338_v18 = vsub.f32 %v1324_v16, %v1334_v7 }
 0x95a   : > { %v1342_v8 = vmul.f32 1.442695, %v1339_v6 }
 0x95b   : > { %v1340_v9 = vmul.f32 1.442695, %v1338_v18 }
 0x95c   : > { %4880 = vpow2.f32 %v1342_v8 }
 0x95d   : > { %4882 = vpow2.f32 %v1340_v9 }
 0x966   : > { %v4881_v10 = vpop.eup %4880 }
 0x967   : > { %v4883_v11 = vpop.eup %4882  ;;  %v1347_v12 = vsel %vm498_vm3, %v4881_v10, 0.0 }
 0x968   : > { %1348 = vadd.xlane.f32.xlu1 %v1347_v12  ;;  %v1344_v13 = vsel %vm498_vm3, %v4883_v11, 0.0 }
 0x969   : > { %1345 = vadd.xlane.f32.xlu0 %v1344_v13 }
 0x979   : > { %4739 = vrot.lane.b32.xlu1 %v5212_v50, %s4987_s18 }
 0x97d   : > { %1443 = vrot.lane.b32.xlu1 %v5208_v49, %s4989_s20 }
 0x97f   : > { %4734 = vrot.lane.b32.xlu0 %v5212_v50, %s4986_s17 }
 0x983   : > { %1445 = vrot.lane.b32.xlu0 %v5204_v48, %s4989_s20 }
 0x9f5   : > { %v1349_v15 = vpop.xlane.xlu1 %1348 }
 0x9f6   : > { %4884 = vrcp.f32 %v1349_v15  ;;  %v1346_v30 = vpop.xlane.xlu0 %1345 }
 0x9f7   : > { %4886 = vrcp.f32 %v1346_v30 }
 0x9f9   : > { %v4740_v31 = vpop.permute.xlu1 %4739 }
 0x9fa   : > { %v4735_v34 = vpop.permute.xlu0 %4734  ;;  %v4742_v35 = vunpack.i.h.bf16 %v4740_v31  ;;  %v4741_v36 = vunpack.i.l.bf16 %v4740_v31 }
 0x9fb   : > { %v4737_v37 = vunpack.i.h.bf16 %v4735_v34  ;;  %v4736_v38 = vunpack.i.l.bf16 %v4735_v34 }
 0x9fc   : > { %v4548_v40 = vpack.c.bf16 %v4742_v35, %v4741_v36 }
 0x9fd   : > { %v4544_v39 = vpack.c.bf16 %v4737_v37, %v4736_v38  ;;  %v1444_v45 = vpop.permute.xlu1 %1443 }
 0x9fe   : > { %v1446_v46 = vpop.permute.xlu0 %1445 }
 0x9ff   : > { %4545 = vmatprep.subr.bf16.mxu0 %v4544_v39 }
 0xa00   : > { %v4885_v41 = vpop.eup %4884  ;;  %4547 = vmatpush3.bf16.msra.mxu0 %v4544_v39 }
 0xa01   : > { %v4887_v42 = vpop.eup %4886  ;;  %4550 = vmatprep.subr.msk.bf16.mxu0 %vm5103_vm2, %v4548_v40  ;;  %v1353_v44 = vmul.f32 %v4885_v41, %v4881_v10 }
 0xa02   : > { %v1352_v43 = vmul.f32 %v4887_v42, %v4883_v11 }
 0xa04   : > { %4313 = vmatprep.mubr.msk.f32.mxu0 %vm498_vm3, %v1352_v43 }
 0xa05   : > { %4314 = vmatmul.mubr.msk.f32.vlgmr.msra.gmra.mrb[16].mxu0 %vm498_vm3, %v1353_v44 }
 0xa06   : > { %4320 = vmatprep.mubr.msk.f32.mxu0 %vm414_vm1, %v1444_v45 }
 0xa09   : > { %4553 = vmatpush3.bf16.xpose.msk.msra.mxu0 %vm5103_vm2, %v4548_v40 }
 0xa10   : > { %4321 = vmatmul.mubr.msk.f32.vlgmr.msra.gmra.mrb[18].mxu0 %vm414_vm1, %v1446_v46 }
 0xad8   : > { %v4315_v47 = vpop.f32.mrb[16].mxu0 }
 0xad9   : > { %1442 = vst.msk [vmem:[#allocation2 + $0x18] sm:$0xff] %vm414_vm1, %v4315_v47  ;;  %v1432_v51 = vpop.f32.mrb[17].mxu0 }
 0xada   : > { %1441 = vst.msk [vmem:[#allocation2 + $0x10] sm:$0xff] %vm414_vm1, %v1432_v51 }
 0xae3   : > { %v4322_v52 = vpop.f32.mrb[18].mxu0 }
 0xae4   : > { %v1531_v20 = vadd.f32 %v4322_v52, %v5116_v32  ;;  %v1525_v53 = vpop.f32.mrb[19].mxu0 }
 0xae5   : > { %v1526_v54 = vadd.f32 %v5118_v33, %v1525_v53 }
 0xae6   : > { %v1537_v21 = vsel %vm498_vm3, %v1531_v20, -inf }
 0xae7   : > { %1538 = vmax.xlane.f32.xlu0 %v1537_v21  ;;  %v1534_v55 = vsel %vm498_vm3, %v1526_v54, -inf }
 0xae8   : > { %1535 = vmax.xlane.f32.xlu1 %v1534_v55 }
 0xb74   : > { %v1539_v56 = vpop.xlane.xlu0 %1538 }
 0xb75   : > { %v1541_v57 = vsub.f32 %v1531_v20, %v1539_v56  ;;  %v1536_v58 = vpop.xlane.xlu1 %1535 }
 0xb76   : > { %v1540_v59 = vsub.f32 %v1526_v54, %v1536_v58 }
 0xb77   : > { %v1544_v60 = vmul.f32 1.442695, %v1541_v57 }
 0xb78   : > { %v1542_v19 = vmul.f32 1.442695, %v1540_v59 }
 0xb79   : > { %4888 = vpow2.f32 %v1544_v60 }
 0xb7a   : > { %4890 = vpow2.f32 %v1542_v19 }
 0xb83   : > { %v4889_v61 = vpop.eup %4888 }
 0xb84   : > { %v4891_v0 = vpop.eup %4890  ;;  %v1549_v1 = vsel %vm498_vm3, %v4889_v61, 0.0 }
 0xb85   : > { %1550 = vadd.xlane.f32.xlu1 %v1549_v1  ;;  %v1546_v2 = vsel %vm498_vm3, %v4891_v0, 0.0 }
 0xb86   : > { %1547 = vadd.xlane.f32.xlu0 %v1546_v2 }
 0xb96   : > { %4749 = vrot.lane.b32.xlu1 %v5212_v50, %s4988_s19 }
 0xb9a   : > { %1653 = vrot.lane.b32.xlu1 %v5208_v49, %s4990_s22 }
 0xb9c   : > { %4744 = vrot.lane.b32.xlu0 %v5212_v50, %s4991_s23 }
 0xba0   : > { %1655 = vrot.lane.b32.xlu0 %v5204_v48, %s4990_s22 }
 0xc12   : > { %v1551_v16 = vpop.xlane.xlu1 %1550 }
 0xc13   : > { %4892 = vrcp.f32 %v1551_v16  ;;  %v1548_v3 = vpop.xlane.xlu0 %1547 }
 0xc14   : > { %4894 = vrcp.f32 %v1548_v3 }
 0xc16   : > { %v4750_v4 = vpop.permute.xlu1 %4749 }
 0xc17   : > { %v4745_v5 = vpop.permute.xlu0 %4744  ;;  %v4752_v6 = vunpack.i.h.bf16 %v4750_v4  ;;  %v4751_v7 = vunpack.i.l.bf16 %v4750_v4 }
 0xc18   : > { %v4747_v18 = vunpack.i.h.bf16 %v4745_v5  ;;  %v4746_v8 = vunpack.i.l.bf16 %v4745_v5 }
 0xc19   : > { %v4558_v10 = vpack.c.bf16 %v4752_v6, %v4751_v7 }
 0xc1a   : > { %v4554_v9 = vpack.c.bf16 %v4747_v18, %v4746_v8  ;;  %v1654_v30 = vpop.permute.xlu1 %1653 }
 0xc1b   : > { %v1656_v31 = vpop.permute.xlu0 %1655 }
 0xc1c   : > { %4555 = vmatprep.subr.bf16.mxu1 %v4554_v9 }
 0xc1d   : > { %v4893_v11 = vpop.eup %4892  ;;  %4557 = vmatpush3.bf16.msra.mxu1 %v4554_v9 }
 0xc1e   : > { %v4895_v12 = vpop.eup %4894  ;;  %4560 = vmatprep.subr.msk.bf16.mxu1 %vm5103_vm2, %v4558_v10  ;;  %v1555_v15 = vmul.f32 %v4893_v11, %v4889_v61 }
 0xc1f   : > { %v1554_v13 = vmul.f32 %v4895_v12, %v4891_v0 }
 0xc21   : > { %4327 = vmatprep.mubr.msk.f32.mxu1 %vm498_vm3, %v1554_v13 }
 0xc22   : > { %4328 = vmatmul.mubr.msk.f32.vlgmr.msra.gmra.mrb[10].mxu1 %vm498_vm3, %v1555_v15 }
 0xc23   : > { %4334 = vmatprep.mubr.msk.f32.mxu1 %vm414_vm1, %v1654_v30 }
 0xc26   : > { %4563 = vmatpush3.bf16.xpose.msk.msra.mxu1 %vm5103_vm2, %v4558_v10 }
 0xc2d   : > { %4335 = vmatmul.mubr.msk.f32.vlgmr.msra.gmra.mrb[12].mxu1 %vm414_vm1, %v1656_v31 }
 0xcf5   : > { %v5278_v34 = vpop.f32.mrb[10].mxu1 }
 0xcf6   : > { %v5280_v35 = vpop.f32.mrb[11].mxu1 }
 0xd00   : > { %v4336_v36 = vpop.f32.mrb[12].mxu1 }
 0xd01   : > { %v1741_v37 = vadd.f32 %v4336_v36, %v5116_v32  ;;  %v1735_v38 = vpop.f32.mrb[13].mxu1 }
 0xd02   : > { %v1736_v39 = vadd.f32 %v5118_v33, %v1735_v38 }
 0xd03   : > { %v1747_v40 = vsel %vm498_vm3, %v1741_v37, -inf }
 0xd04   : > { %1748 = vmax.xlane.f32.xlu0 %v1747_v40  ;;  %v1744_v41 = vsel %vm498_vm3, %v1736_v39, -inf  ;;  %v5320_v40 = vadd.f32 %v5073_v14, %v5095_v23 }
 0xd05   : > { %1745 = vmax.xlane.f32.xlu1 %v1744_v41 }
 0xd91   : > { %v1749_v42 = vpop.xlane.xlu0 %1748 }
 0xd92   : > { %v1751_v43 = vsub.f32 %v1741_v37, %v1749_v42  ;;  %v1746_v44 = vpop.xlane.xlu1 %1745 }
 0xd93   : > { %v1750_v45 = vsub.f32 %v1736_v39, %v1746_v44  ;;  %v5316_v39 = vadd.f32 %v5093_v22, %v5073_v14 }
 0xd94   : > { %v1754_v46 = vmul.f32 1.442695, %v1751_v43 }
 0xd95   : > { %v1752_v47 = vmul.f32 1.442695, %v1750_v45  ;;  %v5324_v41 = vpack.i.bf16 %v5316_v39, %v5320_v40 }
 0xd96   : > { %4896 = vpow2.f32 %v1754_v46 }
 0xd97   : > { %4898 = vpow2.f32 %v1752_v47 }
 0xda0   : > { %v4897_v51 = vpop.eup %4896 }
 0xda1   : > { %v4899_v52 = vpop.eup %4898  ;;  %v1759_v20 = vsel %vm498_vm3, %v4897_v51, 0.0 }
 0xda2   : > { %1760 = vadd.xlane.f32.xlu1 %v1759_v20  ;;  %v1756_v53 = vsel %vm498_vm3, %v4899_v52, 0.0 }
 0xda3   : > { %1757 = vadd.xlane.f32.xlu0 %v1756_v53 }
 0xdb3   : > { %4759 = vrot.lane.b32.xlu1 %v5212_v50, %s4992_s24 }
 0xdb7   : > { %1863 = vrot.lane.b32.xlu1 %v5208_v49, %s4994_s26 }
 0xdb9   : > { %4754 = vrot.lane.b32.xlu0 %v5212_v50, %s4993_s25 }
 0xdbd   : > { %1865 = vrot.lane.b32.xlu0 %v5204_v48, %s4994_s26 }
 0xe2f   : > { %v1761_v54 = vpop.xlane.xlu1 %1760 }
 0xe30   : > { %4900 = vrcp.f32 %v1761_v54  ;;  %v1758_v21 = vpop.xlane.xlu0 %1757 }
 0xe31   : > { %4902 = vrcp.f32 %v1758_v21 }
 0xe33   : > { %v4760_v55 = vpop.permute.xlu1 %4759 }
 0xe34   : > { %v4755_v56 = vpop.permute.xlu0 %4754  ;;  %v4762_v57 = vunpack.i.h.bf16 %v4760_v55  ;;  %v4761_v58 = vunpack.i.l.bf16 %v4760_v55 }
 0xe35   : > { %v4757_v59 = vunpack.i.h.bf16 %v4755_v56  ;;  %v4756_v60 = vunpack.i.l.bf16 %v4755_v56 }
 0xe36   : > { %v4568_v61 = vpack.c.bf16 %v4762_v57, %v4761_v58 }
 0xe37   : > { %v4564_v19 = vpack.c.bf16 %v4757_v59, %v4756_v60  ;;  %v1864_v2 = vpop.permute.xlu1 %1863 }
 0xe38   : > { %v1866_v16 = vpop.permute.xlu0 %1865 }
 0xe39   : > { %4565 = vmatprep.subr.bf16.mxu0 %v4564_v19 }
 0xe3a   : > { %v4901_v49 = vpop.eup %4900  ;;  %4567 = vmatpush3.bf16.msra.mxu0 %v4564_v19 }
 0xe3b   : > { %v4903_v0 = vpop.eup %4902  ;;  %4570 = vmatprep.subr.msk.bf16.mxu0 %vm5103_vm2, %v4568_v61  ;;  %v1765_v1 = vmul.f32 %v4901_v49, %v4897_v51 }
 0xe3c   : > { %v1764_v48 = vmul.f32 %v4903_v0, %v4899_v52 }
 0xe3e   : > { %4341 = vmatprep.mubr.msk.f32.mxu0 %vm498_vm3, %v1764_v48 }
 0xe3f   : > { %4342 = vmatmul.mubr.msk.f32.vlgmr.msra.gmra.mrb[20].mxu0 %vm498_vm3, %v1765_v1 }
 0xe40   : > { %4348 = vmatprep.mubr.msk.f32.mxu0 %vm414_vm1, %v1864_v2 }
 0xe43   : > { %4573 = vmatpush3.bf16.xpose.msk.msra.mxu0 %vm5103_vm2, %v4568_v61 }
 0xe4a   : > { %4349 = vmatmul.mubr.msk.f32.vlgmr.msra.gmra.mrb[22].mxu0 %vm414_vm1, %v1866_v16 }
 0xf12   : > { %v5304_v3 = vpop.f32.mrb[20].mxu0 }
 0xf13   : > { %v5306_v4 = vpop.f32.mrb[21].mxu0 }
 0xf1d   : > { %v4350_v5 = vpop.f32.mrb[22].mxu0 }
 0xf1e   : > { %v1951_v6 = vadd.f32 %v4350_v5, %v5116_v32  ;;  %v1945_v7 = vpop.f32.mrb[23].mxu0 }
 0xf1f   : > { %v1946_v18 = vadd.f32 %v5118_v33, %v1945_v7 }
 0xf20   : > { %v1957_v8 = vsel %vm498_vm3, %v1951_v6, -inf }
 0xf21   : > { %1958 = vmax.xlane.f32.xlu0 %v1957_v8  ;;  %v1954_v9 = vsel %vm498_vm3, %v1946_v18, -inf }
 0xf22   : > { %1955 = vmax.xlane.f32.xlu1 %v1954_v9 }
 0xfae   : > { %v1959_v10 = vpop.xlane.xlu0 %1958 }
 0xfaf   : > { %v1961_v11 = vsub.f32 %v1951_v6, %v1959_v10  ;;  %v1956_v12 = vpop.xlane.xlu1 %1955 }
 0xfb0   : > { %v1960_v13 = vsub.f32 %v1946_v18, %v1956_v12 }
 0xfb1   : > { %v1964_v15 = vmul.f32 1.442695, %v1961_v11 }
 0xfb2   : > { %v1962_v30 = vmul.f32 1.442695, %v1960_v13 }
 0xfb3   : > { %4904 = vpow2.f32 %v1964_v15 }
 0xfb4   : > { %4906 = vpow2.f32 %v1962_v30 }
 0xfbd   : > { %v4905_v31 = vpop.eup %4904 }
 0xfbe   : > { %v4907_v36 = vpop.eup %4906  ;;  %v1969_v37 = vsel %vm498_vm3, %v4905_v31, 0.0 }
 0xfbf   : > { %1970 = vadd.xlane.f32.xlu1 %v1969_v37  ;;  %v1966_v38 = vsel %vm498_vm3, %v4907_v36, 0.0 }
 0xfc0   : > { %1967 = vadd.xlane.f32.xlu0 %v1966_v38 }
 0xfd0   : > { %4769 = vrot.lane.b32.xlu1 %v5324_v41, %s4985_s14 }
 0xfd6   : > { %4764 = vrot.lane.b32.xlu0 %v5212_v50, %s4995_s27 }
0x104c   : > { %v1971_v42 = vpop.xlane.xlu1 %1970 }
0x104d   : > { %4908 = vrcp.f32 %v1971_v42  ;;  %v1968_v43 = vpop.xlane.xlu0 %1967 }
0x104e   : > { %4910 = vrcp.f32 %v1968_v43 }
0x1050   : > { %v4770_v22 = vpop.permute.xlu1 %4769 }
0x1051   : > { %v4765_v44 = vpop.permute.xlu0 %4764  ;;  %v4772_v45 = vunpack.i.h.bf16 %v4770_v22  ;;  %v4771_v46 = vunpack.i.l.bf16 %v4770_v22 }
0x1052   : > { %v4767_v14 = vunpack.i.h.bf16 %v4765_v44  ;;  %v4766_v23 = vunpack.i.l.bf16 %v4765_v44 }
0x1053   : > { %v4578_v51 = vpack.c.bf16 %v4772_v45, %v4771_v46 }
0x1054   : > { %v4574_v47 = vpack.c.bf16 %v4767_v14, %v4766_v23 }
0x1056   : > { %4575 = vmatprep.subr.bf16.mxu1 %v4574_v47 }
0x1057   : > { %v4909_v52 = vpop.eup %4908  ;;  %4577 = vmatpush3.bf16.msra.mxu1 %v4574_v47 }
0x1058   : > { %v4911_v20 = vpop.eup %4910  ;;  %4580 = vmatprep.subr.msk.bf16.mxu1 %vm5103_vm2, %v4578_v51  ;;  %v1975_v53 = vmul.f32 %v4909_v52, %v4905_v31 }
0x1059   : > { %v1974_v50 = vmul.f32 %v4911_v20, %v4907_v36 }
0x105b   : > { %4355 = vmatprep.mubr.msk.f32.mxu1 %vm498_vm3, %v1974_v50 }
0x105c   : > { %4356 = vmatmul.mubr.msk.f32.vlgmr.msra.gmra.mrb[14].mxu1 %vm498_vm3, %v1975_v53 }
0x105d   : > { %4362 = vmatprep.mubr.msk.f32.mxu1 %vm414_vm1, %v5320_v40 }
0x1060   : > { %4583 = vmatpush3.bf16.xpose.msk.msra.mxu1 %vm5103_vm2, %v4578_v51 }
0x1067   : > { %4363 = vmatmul.mubr.msk.f32.vlgmr.msra.gmra.mrb[16].mxu1 %vm414_vm1, %v5316_v39 }
0x112f   : > { %v5340_v54 = vpop.f32.mrb[14].mxu1 }
0x1130   : > { %v5342_v21 = vpop.f32.mrb[15].mxu1 }
0x113a   : > { %v4364_v55 = vpop.f32.mrb[16].mxu1 }
0x113b   : > { %v2159_v56 = vadd.f32 %v4364_v55, %v5116_v32  ;;  %v2153_v57 = vpop.f32.mrb[17].mxu1 }
0x113c   : > { %v2154_v58 = vadd.f32 %v5118_v33, %v2153_v57 }
0x113d   : > { %v2165_v59 = vsel %vm498_vm3, %v2159_v56, -inf }
0x113e   : > { %2166 = vmax.xlane.f32.xlu0 %v2165_v59  ;;  %v2162_v60 = vsel %vm498_vm3, %v2154_v58, -inf }
0x113f   : > { %2163 = vmax.xlane.f32.xlu1 %v2162_v60 }
0x11cb   : > { %v2167_v19 = vpop.xlane.xlu0 %2166 }
0x11cc   : > { %v2169_v61 = vsub.f32 %v2159_v56, %v2167_v19  ;;  %v2164_v49 = vpop.xlane.xlu1 %2163 }
0x11cd   : > { %v2168_v0 = vsub.f32 %v2154_v58, %v2164_v49 }
0x11ce   : > { %v2172_v48 = vmul.f32 1.442695, %v2169_v61 }
0x11cf   : > { %v2170_v1 = vmul.f32 1.442695, %v2168_v0 }
0x11d0   : > { %4912 = vpow2.f32 %v2172_v48 }
0x11d1   : > { %4914 = vpow2.f32 %v2170_v1 }
0x11da   : > { %v4913_v2 = vpop.eup %4912 }
0x11db   : > { %v4915_v16 = vpop.eup %4914  ;;  %v2177_v5 = vsel %vm498_vm3, %v4913_v2, 0.0 }
0x11dc   : > { %2178 = vadd.xlane.f32.xlu1 %v2177_v5  ;;  %v2174_v6 = vsel %vm498_vm3, %v4915_v16, 0.0 }
0x11dd   : > { %2175 = vadd.xlane.f32.xlu0 %v2174_v6 }
0x11ed   : > { %4779 = vrot.lane.b32.xlu1 %v5324_v41, %s4987_s18 }
0x11f1   : > { %2273 = vrot.lane.b32.xlu1 %v5320_v40, %s4989_s20 }
0x11f3   : > { %4774 = vrot.lane.b32.xlu0 %v5324_v41, %s4986_s17 }
0x11f7   : > { %2275 = vrot.lane.b32.xlu0 %v5316_v39, %s4989_s20 }
0x1269   : > { %v2179_v7 = vpop.xlane.xlu1 %2178 }
0x126a   : > { %4916 = vrcp.f32 %v2179_v7  ;;  %v2176_v18 = vpop.xlane.xlu0 %2175 }
0x126b   : > { %4918 = vrcp.f32 %v2176_v18 }
0x126d   : > { %v4780_v8 = vpop.permute.xlu1 %4779 }
0x126e   : > { %v4775_v9 = vpop.permute.xlu0 %4774  ;;  %v4782_v10 = vunpack.i.h.bf16 %v4780_v8  ;;  %v4781_v11 = vunpack.i.l.bf16 %v4780_v8 }
0x126f   : > { %v4777_v12 = vunpack.i.h.bf16 %v4775_v9  ;;  %v4776_v13 = vunpack.i.l.bf16 %v4775_v9 }
0x1270   : > { %v4588_v30 = vpack.c.bf16 %v4782_v10, %v4781_v11 }
0x1271   : > { %v4584_v15 = vpack.c.bf16 %v4777_v12, %v4776_v13  ;;  %v2274_v42 = vpop.permute.xlu1 %2273 }
0x1272   : > { %v2276_v43 = vpop.permute.xlu0 %2275 }
0x1273   : > { %4585 = vmatprep.subr.bf16.mxu0 %v4584_v15 }
0x1274   : > { %v4917_v31 = vpop.eup %4916  ;;  %4587 = vmatpush3.bf16.msra.mxu0 %v4584_v15 }
0x1275   : > { %v4919_v36 = vpop.eup %4918  ;;  %4590 = vmatprep.subr.msk.bf16.mxu0 %vm5103_vm2, %v4588_v30  ;;  %v2183_v38 = vmul.f32 %v4917_v31, %v4913_v2 }
0x1276   : > { %v2182_v37 = vmul.f32 %v4919_v36, %v4915_v16 }
0x1278   : > { %4369 = vmatprep.mubr.msk.f32.mxu0 %vm498_vm3, %v2182_v37 }
0x1279   : > { %4370 = vmatmul.mubr.msk.f32.vlgmr.msra.gmra.mrb[24].mxu0 %vm498_vm3, %v2183_v38 }
0x127a   : > { %4376 = vmatprep.mubr.msk.f32.mxu0 %vm414_vm1, %v2274_v42 }
0x127d   : > { %4593 = vmatpush3.bf16.xpose.msk.msra.mxu0 %vm5103_vm2, %v4588_v30 }
0x1284   : > { %4377 = vmatmul.mubr.msk.f32.vlgmr.msra.gmra.mrb[26].mxu0 %vm414_vm1, %v2276_v43 }
0x134c   : > { %v4371_v22 = vpop.f32.mrb[24].mxu0 }
0x134d   : > { %2272 = vst.msk [vmem:[#allocation2 + $0x28] sm:$0xff] %vm414_vm1, %v4371_v22  ;;  %v2262_v44 = vpop.f32.mrb[25].mxu0 }
0x134e   : > { %2271 = vst.msk [vmem:[#allocation2 + $0x20] sm:$0xff] %vm414_vm1, %v2262_v44 }
0x1357   : > { %v4378_v45 = vpop.f32.mrb[26].mxu0 }
0x1358   : > { %v2361_v46 = vadd.f32 %v4378_v45, %v5116_v32  ;;  %v2355_v14 = vpop.f32.mrb[27].mxu0 }
0x1359   : > { %v2356_v23 = vadd.f32 %v5118_v33, %v2355_v14 }
0x135a   : > { %v2367_v47 = vsel %vm498_vm3, %v2361_v46, -inf }
0x135b   : > { %2368 = vmax.xlane.f32.xlu0 %v2367_v47  ;;  %v2364_v51 = vsel %vm498_vm3, %v2356_v23, -inf }
0x135c   : > { %2365 = vmax.xlane.f32.xlu1 %v2364_v51 }
0x13e8   : > { %v2369_v52 = vpop.xlane.xlu0 %2368 }
0x13e9   : > { %v2371_v20 = vsub.f32 %v2361_v46, %v2369_v52  ;;  %v2366_v50 = vpop.xlane.xlu1 %2365 }
0x13ea   : > { %v2370_v53 = vsub.f32 %v2356_v23, %v2366_v50 }
0x13eb   : > { %v2374_v55 = vmul.f32 1.442695, %v2371_v20 }
0x13ec   : > { %v2372_v56 = vmul.f32 1.442695, %v2370_v53 }
0x13ed   : > { %4920 = vpow2.f32 %v2374_v55 }
0x13ee   : > { %4922 = vpow2.f32 %v2372_v56 }
0x13f7   : > { %v4921_v57 = vpop.eup %4920 }
0x13f8   : > { %v4923_v58 = vpop.eup %4922  ;;  %v2379_v59 = vsel %vm498_vm3, %v4921_v57, 0.0 }
0x13f9   : > { %2380 = vadd.xlane.f32.xlu1 %v2379_v59  ;;  %v2376_v60 = vsel %vm498_vm3, %v4923_v58, 0.0 }
0x13fa   : > { %2377 = vadd.xlane.f32.xlu0 %v2376_v60 }
0x140a   : > { %4789 = vrot.lane.b32.xlu1 %v5324_v41, %s4988_s19 }
0x140e   : > { %2483 = vrot.lane.b32.xlu1 %v5320_v40, %s4990_s22 }
0x1410   : > { %4784 = vrot.lane.b32.xlu0 %v5324_v41, %s4991_s23 }
0x1414   : > { %2485 = vrot.lane.b32.xlu0 %v5316_v39, %s4990_s22 }
0x1486   : > { %v2381_v19 = vpop.xlane.xlu1 %2380 }
0x1487   : > { %4924 = vrcp.f32 %v2381_v19  ;;  %v2378_v61 = vpop.xlane.xlu0 %2377 }
0x1488   : > { %4926 = vrcp.f32 %v2378_v61 }
0x148a   : > { %v4790_v49 = vpop.permute.xlu1 %4789 }
0x148b   : > { %v4785_v0 = vpop.permute.xlu0 %4784  ;;  %v4792_v48 = vunpack.i.h.bf16 %v4790_v49  ;;  %v4791_v1 = vunpack.i.l.bf16 %v4790_v49 }
0x148c   : > { %v4787_v2 = vunpack.i.h.bf16 %v4785_v0  ;;  %v4786_v16 = vunpack.i.l.bf16 %v4785_v0 }
0x148d   : > { %v4598_v6 = vpack.c.bf16 %v4792_v48, %v4791_v1 }
0x148e   : > { %v4594_v5 = vpack.c.bf16 %v4787_v2, %v4786_v16  ;;  %v2484_v10 = vpop.permute.xlu1 %2483 }
0x148f   : > { %v2486_v11 = vpop.permute.xlu0 %2485 }
0x1490   : > { %4595 = vmatprep.subr.bf16.mxu1 %v4594_v5 }
0x1491   : > { %v4925_v7 = vpop.eup %4924  ;;  %4597 = vmatpush3.bf16.msra.mxu1 %v4594_v5 }
0x1492   : > { %v4927_v18 = vpop.eup %4926  ;;  %4600 = vmatprep.subr.msk.bf16.mxu1 %vm5103_vm2, %v4598_v6  ;;  %v2385_v9 = vmul.f32 %v4925_v7, %v4921_v57 }
0x1493   : > { %v2384_v8 = vmul.f32 %v4927_v18, %v4923_v58 }
0x1495   : > { %4383 = vmatprep.mubr.msk.f32.mxu1 %vm498_vm3, %v2384_v8 }
0x1496   : > { %4384 = vmatmul.mubr.msk.f32.vlgmr.msra.gmra.mrb[18].mxu1 %vm498_vm3, %v2385_v9 }
0x1497   : > { %4390 = vmatprep.mubr.msk.f32.mxu1 %vm414_vm1, %v2484_v10 }
0x149a   : > { %4603 = vmatpush3.bf16.xpose.msk.msra.mxu1 %vm5103_vm2, %v4598_v6 }
0x14a1   : > { %4391 = vmatmul.mubr.msk.f32.vlgmr.msra.gmra.mrb[20].mxu1 %vm414_vm1, %v2486_v11 }
0x1569   : > { %v5390_v12 = vpop.f32.mrb[18].mxu1 }
0x156a   : > { %v5392_v13 = vpop.f32.mrb[19].mxu1 }
0x1574   : > { %v4392_v15 = vpop.f32.mrb[20].mxu1 }
0x1575   : > { %v2571_v30 = vadd.f32 %v4392_v15, %v5116_v32  ;;  %v2565_v31 = vpop.f32.mrb[21].mxu1 }
0x1576   : > { %v2566_v36 = vadd.f32 %v5118_v33, %v2565_v31 }
0x1577   : > { %v2577_v37 = vsel %vm498_vm3, %v2571_v30, -inf }
0x1578   : > { %2578 = vmax.xlane.f32.xlu0 %v2577_v37  ;;  %v2574_v38 = vsel %vm498_vm3, %v2566_v36, -inf }
0x1579   : > { %2575 = vmax.xlane.f32.xlu1 %v2574_v38 }
0x1605   : > { %v2579_v42 = vpop.xlane.xlu0 %2578 }
0x1606   : > { %v2581_v43 = vsub.f32 %v2571_v30, %v2579_v42  ;;  %v2576_v22 = vpop.xlane.xlu1 %2575  ;;  %v4976_v42 = vld [vmem:[%s5646_s2] ss:$0 sm:$0xff] }
0x1607   : > { %v2580_v44 = vsub.f32 %v2566_v36, %v2576_v22  ;;  %v5433_v22 = vadd.f32 %v4976_v42, %v5099_v25 }
0x1608   : > { %v2584_v45 = vmul.f32 1.442695, %v2581_v43  ;;  %v5430_v43 = vadd.f32 %v4976_v42, %v5097_v24 }
0x1609   : > { %v2582_v46 = vmul.f32 1.442695, %v2580_v44 }
0x160a   : > { %4928 = vpow2.f32 %v2584_v45  ;;  %v5437_v44 = vpack.i.bf16 %v5430_v43, %v5433_v22 }
0x160b   : > { %4930 = vpow2.f32 %v2582_v46 }
0x1614   : > { %v4929_v14 = vpop.eup %4928 }
0x1615   : > { %v4931_v23 = vpop.eup %4930  ;;  %v2589_v47 = vsel %vm498_vm3, %v4929_v14, 0.0 }
0x1616   : > { %2590 = vadd.xlane.f32.xlu1 %v2589_v47  ;;  %v2586_v51 = vsel %vm498_vm3, %v4931_v23, 0.0 }
0x1617   : > { %2587 = vadd.xlane.f32.xlu0 %v2586_v51 }
0x1627   : > { %4799 = vrot.lane.b32.xlu1 %v5324_v41, %s4992_s24 }
0x162b   : > { %2693 = vrot.lane.b32.xlu1 %v5320_v40, %s4994_s26 }
0x162d   : > { %4794 = vrot.lane.b32.xlu0 %v5324_v41, %s4993_s25 }
0x1631   : > { %2695 = vrot.lane.b32.xlu0 %v5316_v39, %s4994_s26 }
0x16a3   : > { %v2591_v52 = vpop.xlane.xlu1 %2590 }
0x16a4   : > { %4932 = vrcp.f32 %v2591_v52  ;;  %v2588_v20 = vpop.xlane.xlu0 %2587 }
0x16a5   : > { %4934 = vrcp.f32 %v2588_v20 }
0x16a7   : > { %v4800_v50 = vpop.permute.xlu1 %4799 }
0x16a8   : > { %v4795_v53 = vpop.permute.xlu0 %4794  ;;  %v4802_v55 = vunpack.i.h.bf16 %v4800_v50  ;;  %v4801_v56 = vunpack.i.l.bf16 %v4800_v50 }
0x16a9   : > { %v4797_v57 = vunpack.i.h.bf16 %v4795_v53  ;;  %v4796_v58 = vunpack.i.l.bf16 %v4795_v53 }
0x16aa   : > { %v4608_v60 = vpack.c.bf16 %v4802_v55, %v4801_v56 }
0x16ab   : > { %v4604_v59 = vpack.c.bf16 %v4797_v57, %v4796_v58  ;;  %v2694_v49 = vpop.permute.xlu1 %2693 }
0x16ac   : > { %v2696_v0 = vpop.permute.xlu0 %2695 }
0x16ad   : > { %4605 = vmatprep.subr.bf16.mxu0 %v4604_v59 }
0x16ae   : > { %v4933_v40 = vpop.eup %4932  ;;  %4607 = vmatpush3.bf16.msra.mxu0 %v4604_v59 }
0x16af   : > { %v4935_v19 = vpop.eup %4934  ;;  %4610 = vmatprep.subr.msk.bf16.mxu0 %vm5103_vm2, %v4608_v60  ;;  %v2595_v61 = vmul.f32 %v4933_v40, %v4929_v14 }
0x16b0   : > { %v2594_v39 = vmul.f32 %v4935_v19, %v4931_v23 }
0x16b2   : > { %4397 = vmatprep.mubr.msk.f32.mxu0 %vm498_vm3, %v2594_v39 }
0x16b3   : > { %4398 = vmatmul.mubr.msk.f32.vlgmr.msra.gmra.mrb[28].mxu0 %vm498_vm3, %v2595_v61 }
0x16b4   : > { %4404 = vmatprep.mubr.msk.f32.mxu0 %vm414_vm1, %v2694_v49 }
0x16b7   : > { %4613 = vmatpush3.bf16.xpose.msk.msra.mxu0 %vm5103_vm2, %v4608_v60 }
0x16be   : > { %4405 = vmatmul.mubr.msk.f32.vlgmr.msra.gmra.mrb[30].mxu0 %vm414_vm1, %v2696_v0 }
0x1786   : > { %v5416_v48 = vpop.f32.mrb[28].mxu0 }
0x1787   : > { %v5418_v1 = vpop.f32.mrb[29].mxu0 }
0x1791   : > { %v4406_v2 = vpop.f32.mrb[30].mxu0 }
0x1792   : > { %v2781_v16 = vadd.f32 %v4406_v2, %v5116_v32  ;;  %v2775_v5 = vpop.f32.mrb[31].mxu0 }
0x1793   : > { %v2776_v6 = vadd.f32 %v5118_v33, %v2775_v5 }
0x1794   : > { %v2787_v7 = vsel %vm498_vm3, %v2781_v16, -inf }
0x1795   : > { %2788 = vmax.xlane.f32.xlu0 %v2787_v7  ;;  %v2784_v18 = vsel %vm498_vm3, %v2776_v6, -inf }
0x1796   : > { %2785 = vmax.xlane.f32.xlu1 %v2784_v18 }
0x1822   : > { %v2789_v8 = vpop.xlane.xlu0 %2788 }
0x1823   : > { %v2791_v9 = vsub.f32 %v2781_v16, %v2789_v8  ;;  %v2786_v10 = vpop.xlane.xlu1 %2785 }
0x1824   : > { %v2790_v11 = vsub.f32 %v2776_v6, %v2786_v10 }
0x1825   : > { %v2794_v15 = vmul.f32 1.442695, %v2791_v9 }
0x1826   : > { %v2792_v30 = vmul.f32 1.442695, %v2790_v11 }
0x1827   : > { %4936 = vpow2.f32 %v2794_v15 }
0x1828   : > { %4938 = vpow2.f32 %v2792_v30 }
0x1831   : > { %v4937_v31 = vpop.eup %4936 }
0x1832   : > { %v4939_v36 = vpop.eup %4938  ;;  %v2799_v37 = vsel %vm498_vm3, %v4937_v31, 0.0 }
0x1833   : > { %2800 = vadd.xlane.f32.xlu1 %v2799_v37  ;;  %v2796_v38 = vsel %vm498_vm3, %v4939_v36, 0.0 }
0x1834   : > { %2797 = vadd.xlane.f32.xlu0 %v2796_v38 }
0x1844   : > { %4809 = vrot.lane.b32.xlu1 %v5437_v44, %s4985_s14 }
0x184a   : > { %4804 = vrot.lane.b32.xlu0 %v5324_v41, %s4995_s27 }
0x18c0   : > { %v2801_v45 = vpop.xlane.xlu1 %2800 }
0x18c1   : > { %4940 = vrcp.f32 %v2801_v45  ;;  %v2798_v46 = vpop.xlane.xlu0 %2797 }
0x18c2   : > { %4942 = vrcp.f32 %v2798_v46 }
0x18c4   : > { %v4810_v14 = vpop.permute.xlu1 %4809 }
0x18c5   : > { %v4805_v24 = vpop.permute.xlu0 %4804  ;;  %v4812_v23 = vunpack.i.h.bf16 %v4810_v14  ;;  %v4811_v47 = vunpack.i.l.bf16 %v4810_v14 }
0x18c6   : > { %v4807_v25 = vunpack.i.h.bf16 %v4805_v24  ;;  %v4806_v51 = vunpack.i.l.bf16 %v4805_v24 }
0x18c7   : > { %v4618_v20 = vpack.c.bf16 %v4812_v23, %v4811_v47 }
0x18c8   : > { %v4614_v52 = vpack.c.bf16 %v4807_v25, %v4806_v51 }
0x18ca   : > { %4615 = vmatprep.subr.bf16.mxu1 %v4614_v52 }
0x18cb   : > { %v4941_v50 = vpop.eup %4940  ;;  %4617 = vmatpush3.bf16.msra.mxu1 %v4614_v52 }
0x18cc   : > { %v4943_v53 = vpop.eup %4942  ;;  %4620 = vmatprep.subr.msk.bf16.mxu1 %vm5103_vm2, %v4618_v20  ;;  %v2805_v55 = vmul.f32 %v4941_v50, %v4937_v31 }
0x18cd   : > { %v2804_v41 = vmul.f32 %v4943_v53, %v4939_v36 }
0x18cf   : > { %4411 = vmatprep.mubr.msk.f32.mxu1 %vm498_vm3, %v2804_v41 }
0x18d0   : > { %4412 = vmatmul.mubr.msk.f32.vlgmr.msra.gmra.mrb[22].mxu1 %vm498_vm3, %v2805_v55 }
0x18d1   : > { %4418 = vmatprep.mubr.msk.f32.mxu1 %vm414_vm1, %v5433_v22 }
0x18d4   : > { %4623 = vmatpush3.bf16.xpose.msk.msra.mxu1 %vm5103_vm2, %v4618_v20 }
0x18db   : > { %4419 = vmatmul.mubr.msk.f32.vlgmr.msra.gmra.mrb[24].mxu1 %vm414_vm1, %v5430_v43 }
0x19a3   : > { %v5453_v56 = vpop.f32.mrb[22].mxu1 }
0x19a4   : > { %v5455_v57 = vpop.f32.mrb[23].mxu1 }
0x19ae   : > { %v4420_v58 = vpop.f32.mrb[24].mxu1 }
0x19af   : > { %v2989_v59 = vadd.f32 %v4420_v58, %v5116_v32  ;;  %v2983_v60 = vpop.f32.mrb[25].mxu1 }
0x19b0   : > { %v2984_v40 = vadd.f32 %v5118_v33, %v2983_v60 }
0x19b1   : > { %v2995_v19 = vsel %vm498_vm3, %v2989_v59, -inf }
0x19b2   : > { %2996 = vmax.xlane.f32.xlu0 %v2995_v19  ;;  %v2992_v39 = vsel %vm498_vm3, %v2984_v40, -inf }
0x19b3   : > { %2993 = vmax.xlane.f32.xlu1 %v2992_v39 }
0x1a3f   : > { %v2997_v61 = vpop.xlane.xlu0 %2996 }
0x1a40   : > { %v2999_v49 = vsub.f32 %v2989_v59, %v2997_v61  ;;  %v2994_v0 = vpop.xlane.xlu1 %2993 }
0x1a41   : > { %v2998_v2 = vsub.f32 %v2984_v40, %v2994_v0 }
0x1a42   : > { %v3002_v16 = vmul.f32 1.442695, %v2999_v49 }
0x1a43   : > { %v3000_v5 = vmul.f32 1.442695, %v2998_v2 }
0x1a44   : > { %4944 = vpow2.f32 %v3002_v16 }
0x1a45   : > { %4946 = vpow2.f32 %v3000_v5 }
0x1a4e   : > { %v4945_v6 = vpop.eup %4944 }
0x1a4f   : > { %v4947_v7 = vpop.eup %4946  ;;  %v3007_v18 = vsel %vm498_vm3, %v4945_v6, 0.0 }
0x1a50   : > { %3008 = vadd.xlane.f32.xlu1 %v3007_v18  ;;  %v3004_v8 = vsel %vm498_vm3, %v4947_v7, 0.0 }
0x1a51   : > { %3005 = vadd.xlane.f32.xlu0 %v3004_v8 }
0x1a61   : > { %4819 = vrot.lane.b32.xlu1 %v5437_v44, %s4987_s18 }
0x1a65   : > { %3103 = vrot.lane.b32.xlu1 %v5433_v22, %s4989_s20 }
0x1a67   : > { %4814 = vrot.lane.b32.xlu0 %v5437_v44, %s4986_s17 }
0x1a6b   : > { %3105 = vrot.lane.b32.xlu0 %v5430_v43, %s4989_s20 }
0x1add   : > { %v3009_v9 = vpop.xlane.xlu1 %3008 }
0x1ade   : > { %4948 = vrcp.f32 %v3009_v9  ;;  %v3006_v10 = vpop.xlane.xlu0 %3005 }
0x1adf   : > { %4950 = vrcp.f32 %v3006_v10 }
0x1ae1   : > { %v4820_v11 = vpop.permute.xlu1 %4819 }
0x1ae2   : > { %v4815_v15 = vpop.permute.xlu0 %4814  ;;  %v4822_v30 = vunpack.i.h.bf16 %v4820_v11  ;;  %v4821_v31 = vunpack.i.l.bf16 %v4820_v11 }
0x1ae3   : > { %v4817_v36 = vunpack.i.h.bf16 %v4815_v15  ;;  %v4816_v37 = vunpack.i.l.bf16 %v4815_v15 }
0x1ae4   : > { %v4628_v42 = vpack.c.bf16 %v4822_v30, %v4821_v31 }
0x1ae5   : > { %v4624_v38 = vpack.c.bf16 %v4817_v36, %v4816_v37  ;;  %v3104_v23 = vpop.permute.xlu1 %3103 }
0x1ae6   : > { %v3106_v47 = vpop.permute.xlu0 %3105 }
0x1ae7   : > { %4625 = vmatprep.subr.bf16.mxu0 %v4624_v38 }
0x1ae8   : > { %v4949_v45 = vpop.eup %4948  ;;  %4627 = vmatpush3.bf16.msra.mxu0 %v4624_v38 }
0x1ae9   : > { %v4951_v46 = vpop.eup %4950  ;;  %4630 = vmatprep.subr.msk.bf16.mxu0 %vm5103_vm2, %v4628_v42  ;;  %v3013_v24 = vmul.f32 %v4949_v45, %v4945_v6 }
0x1aea   : > { %v3012_v14 = vmul.f32 %v4951_v46, %v4947_v7 }
0x1aec   : > { %4425 = vmatprep.mubr.msk.f32.mxu0 %vm498_vm3, %v3012_v14 }
0x1aed   : > { %4426 = vmatmul.mubr.msk.f32.vlgmr.msra.gmra.mrb[32].mxu0 %vm498_vm3, %v3013_v24 }
0x1aee   : > { %4432 = vmatprep.mubr.msk.f32.mxu0 %vm414_vm1, %v3104_v23 }
0x1af1   : > { %4633 = vmatpush3.bf16.xpose.msk.msra.mxu0 %vm5103_vm2, %v4628_v42 }
0x1af8   : > { %4433 = vmatmul.mubr.msk.f32.vlgmr.msra.gmra.mrb[34].mxu0 %vm414_vm1, %v3106_v47 }
0x1bc0   : > { %v4427_v25 = vpop.f32.mrb[32].mxu0 }
0x1bc1   : > { %3102 = vst.msk [vmem:[#allocation2 + $0x38] sm:$0xff] %vm414_vm1, %v4427_v25  ;;  %v3092_v51 = vpop.f32.mrb[33].mxu0 }
0x1bc2   : > { %3101 = vst.msk [vmem:[#allocation2 + $0x30] sm:$0xff] %vm414_vm1, %v3092_v51 }
0x1bcb   : > { %v4434_v52 = vpop.f32.mrb[34].mxu0 }
0x1bcc   : > { %v3191_v20 = vadd.f32 %v4434_v52, %v5116_v32  ;;  %v3185_v50 = vpop.f32.mrb[35].mxu0 }
0x1bcd   : > { %v3186_v53 = vadd.f32 %v5118_v33, %v3185_v50 }
0x1bce   : > { %v3197_v41 = vsel %vm498_vm3, %v3191_v20, -inf }
0x1bcf   : > { %3198 = vmax.xlane.f32.xlu0 %v3197_v41  ;;  %v3194_v55 = vsel %vm498_vm3, %v3186_v53, -inf }
0x1bd0   : > { %3195 = vmax.xlane.f32.xlu1 %v3194_v55 }
0x1c5c   : > { %v3199_v58 = vpop.xlane.xlu0 %3198 }
0x1c5d   : > { %v3201_v59 = vsub.f32 %v3191_v20, %v3199_v58  ;;  %v3196_v60 = vpop.xlane.xlu1 %3195 }
0x1c5e   : > { %v3200_v40 = vsub.f32 %v3186_v53, %v3196_v60 }
0x1c5f   : > { %v3204_v19 = vmul.f32 1.442695, %v3201_v59 }
0x1c60   : > { %v3202_v39 = vmul.f32 1.442695, %v3200_v40 }
0x1c61   : > { %4952 = vpow2.f32 %v3204_v19 }
0x1c62   : > { %4954 = vpow2.f32 %v3202_v39 }
0x1c6b   : > { %v4953_v61 = vpop.eup %4952 }
0x1c6c   : > { %v4955_v49 = vpop.eup %4954  ;;  %v3209_v0 = vsel %vm498_vm3, %v4953_v61, 0.0 }
0x1c6d   : > { %3210 = vadd.xlane.f32.xlu1 %v3209_v0  ;;  %v3206_v2 = vsel %vm498_vm3, %v4955_v49, 0.0 }
0x1c6e   : > { %3207 = vadd.xlane.f32.xlu0 %v3206_v2 }
0x1c7e   : > { %4829 = vrot.lane.b32.xlu1 %v5437_v44, %s4988_s19 }
0x1c82   : > { %3313 = vrot.lane.b32.xlu1 %v5433_v22, %s4990_s22 }
0x1c84   : > { %4824 = vrot.lane.b32.xlu0 %v5437_v44, %s4991_s23 }
0x1c88   : > { %3315 = vrot.lane.b32.xlu0 %v5430_v43, %s4990_s22 }
0x1cfa   : > { %v3211_v16 = vpop.xlane.xlu1 %3210 }
0x1cfb   : > { %4956 = vrcp.f32 %v3211_v16  ;;  %v3208_v5 = vpop.xlane.xlu0 %3207 }
0x1cfc   : > { %4958 = vrcp.f32 %v3208_v5 }
0x1cfe   : > { %v4830_v6 = vpop.permute.xlu1 %4829 }
0x1cff   : > { %v4825_v7 = vpop.permute.xlu0 %4824  ;;  %v4832_v18 = vunpack.i.h.bf16 %v4830_v6  ;;  %v4831_v8 = vunpack.i.l.bf16 %v4830_v6 }
0x1d00   : > { %v4827_v9 = vunpack.i.h.bf16 %v4825_v7  ;;  %v4826_v10 = vunpack.i.l.bf16 %v4825_v7 }
0x1d01   : > { %v4638_v15 = vpack.c.bf16 %v4832_v18, %v4831_v8 }
0x1d02   : > { %v4634_v11 = vpack.c.bf16 %v4827_v9, %v4826_v10  ;;  %v3314_v38 = vpop.permute.xlu1 %3313 }
0x1d03   : > { %v3316_v42 = vpop.permute.xlu0 %3315 }
0x1d04   : > { %4635 = vmatprep.subr.bf16.mxu1 %v4634_v11 }
0x1d05   : > { %v4957_v30 = vpop.eup %4956  ;;  %4637 = vmatpush3.bf16.msra.mxu1 %v4634_v11 }
0x1d06   : > { %v4959_v31 = vpop.eup %4958  ;;  %4640 = vmatprep.subr.msk.bf16.mxu1 %vm5103_vm2, %v4638_v15  ;;  %v3215_v37 = vmul.f32 %v4957_v30, %v4953_v61 }
0x1d07   : > { %v3214_v36 = vmul.f32 %v4959_v31, %v4955_v49 }
0x1d09   : > { %4439 = vmatprep.mubr.msk.f32.mxu1 %vm498_vm3, %v3214_v36 }
0x1d0a   : > { %4440 = vmatmul.mubr.msk.f32.vlgmr.msra.gmra.mrb[26].mxu1 %vm498_vm3, %v3215_v37 }
0x1d0b   : > { %4446 = vmatprep.mubr.msk.f32.mxu1 %vm414_vm1, %v3314_v38 }
0x1d0e   : > { %4643 = vmatpush3.bf16.xpose.msk.msra.mxu1 %vm5103_vm2, %v4638_v15 }
0x1d15   : > { %4447 = vmatmul.mubr.msk.f32.vlgmr.msra.gmra.mrb[28].mxu1 %vm414_vm1, %v3316_v42 }
0x1ddd   : > { %v5503_v45 = vpop.f32.mrb[26].mxu1 }
0x1dde   : > { %v5505_v46 = vpop.f32.mrb[27].mxu1 }
0x1de8   : > { %v4448_v14 = vpop.f32.mrb[28].mxu1 }
0x1de9   : > { %v3401_v24 = vadd.f32 %v4448_v14, %v5116_v32  ;;  %v3395_v23 = vpop.f32.mrb[29].mxu1 }
0x1dea   : > { %v3396_v47 = vadd.f32 %v5118_v33, %v3395_v23 }
0x1deb   : > { %v3407_v25 = vsel %vm498_vm3, %v3401_v24, -inf }
0x1dec   : > { %3408 = vmax.xlane.f32.xlu0 %v3407_v25  ;;  %v3404_v51 = vsel %vm498_vm3, %v3396_v47, -inf }
0x1ded   : > { %3405 = vmax.xlane.f32.xlu1 %v3404_v51 }
0x1e79   : > { %v3409_v52 = vpop.xlane.xlu0 %3408 }
0x1e7a   : > { %v3411_v20 = vsub.f32 %v3401_v24, %v3409_v52  ;;  %v3406_v50 = vpop.xlane.xlu1 %3405 }
0x1e7b   : > { %v3410_v53 = vsub.f32 %v3396_v47, %v3406_v50 }
0x1e7c   : > { %v3414_v41 = vmul.f32 1.442695, %v3411_v20 }
0x1e7d   : > { %v3412_v55 = vmul.f32 1.442695, %v3410_v53 }
0x1e7e   : > { %4960 = vpow2.f32 %v3414_v41 }
0x1e7f   : > { %4962 = vpow2.f32 %v3412_v55 }
0x1e88   : > { %v4961_v58 = vpop.eup %4960 }
0x1e89   : > { %v4963_v59 = vpop.eup %4962  ;;  %v3419_v60 = vsel %vm498_vm3, %v4961_v58, 0.0 }
0x1e8a   : > { %3420 = vadd.xlane.f32.xlu1 %v3419_v60  ;;  %v3416_v40 = vsel %vm498_vm3, %v4963_v59, 0.0 }
0x1e8b   : > { %3417 = vadd.xlane.f32.xlu0 %v3416_v40 }
0x1e9b   : > { %4839 = vrot.lane.b32.xlu1 %v5437_v44, %s4992_s24  ;;  %s5619_s24 = scalar_lea.vmem %s5650_s6, %s3951_s8 }
0x1e9f   : > { %3523 = vrot.lane.b32.xlu1 %v5433_v22, %s4994_s26 }
0x1ea1   : > { %4834 = vrot.lane.b32.xlu0 %v5437_v44, %s4993_s25 }
0x1ea5   : > { %3525 = vrot.lane.b32.xlu0 %v5430_v43, %s4994_s26 }
0x1f17   : > { %v3421_v19 = vpop.xlane.xlu1 %3420 }
0x1f18   : > { %4964 = vrcp.f32 %v3421_v19  ;;  %v3418_v39 = vpop.xlane.xlu0 %3417 }
0x1f19   : > { %4966 = vrcp.f32 %v3418_v39 }
0x1f1b   : > { %v4840_v61 = vpop.permute.xlu1 %4839 }
0x1f1c   : > { %v4835_v49 = vpop.permute.xlu0 %4834  ;;  %v4842_v0 = vunpack.i.h.bf16 %v4840_v61  ;;  %v4841_v2 = vunpack.i.l.bf16 %v4840_v61 }
0x1f1d   : > { %v4837_v16 = vunpack.i.h.bf16 %v4835_v49  ;;  %v4836_v5 = vunpack.i.l.bf16 %v4835_v49 }
0x1f1e   : > { %v4648_v7 = vpack.c.bf16 %v4842_v0, %v4841_v2 }
0x1f1f   : > { %v4644_v6 = vpack.c.bf16 %v4837_v16, %v4836_v5  ;;  %v3524_v9 = vpop.permute.xlu1 %3523 }
0x1f20   : > { %v3526_v10 = vpop.permute.xlu0 %3525 }
0x1f21   : > { %4645 = vmatprep.subr.bf16.mxu0 %v4644_v6 }
0x1f22   : > { %v4965_v22 = vpop.eup %4964  ;;  %4647 = vmatpush3.bf16.msra.mxu0 %v4644_v6 }
0x1f23   : > { %v4967_v18 = vpop.eup %4966  ;;  %4650 = vmatprep.subr.msk.bf16.mxu0 %vm5103_vm2, %v4648_v7  ;;  %v3425_v8 = vmul.f32 %v4965_v22, %v4961_v58 }
0x1f24   : > { %v3424_v43 = vmul.f32 %v4967_v18, %v4963_v59 }
0x1f26   : > { %4453 = vmatprep.mubr.msk.f32.mxu0 %vm498_vm3, %v3424_v43 }
0x1f27   : > { %4454 = vmatmul.mubr.msk.f32.vlgmr.msra.gmra.mrb[36].mxu0 %vm498_vm3, %v3425_v8 }
0x1f28   : > { %4460 = vmatprep.mubr.msk.f32.mxu0 %vm414_vm1, %v3524_v9 }
0x1f2b   : > { %4653 = vmatpush3.bf16.xpose.msk.msra.mxu0 %vm5103_vm2, %v4648_v7 }
0x1f32   : > { %4461 = vmatmul.mubr.msk.f32.vlgmr.msra.gmra.mrb[38].mxu0 %vm414_vm1, %v3526_v10 }
0x1ffa   : > { %v4455_v11 = vpop.f32.mrb[36].mxu0 }
0x1ffb   : > { %v3504_v15 = vpop.f32.mrb[37].mxu0 }
0x2005   : > { %v4462_v30 = vpop.f32.mrb[38].mxu0 }
0x2006   : > { %v3611_v31 = vadd.f32 %v4462_v30, %v5116_v32  ;;  %v3605_v36 = vpop.f32.mrb[39].mxu0 }
0x2007   : > { %v3606_v37 = vadd.f32 %v5118_v33, %v3605_v36 }
0x2008   : > { %v3617_v38 = vsel %vm498_vm3, %v3611_v31, -inf }
0x2009   : > { %3618 = vmax.xlane.f32.xlu0 %v3617_v38  ;;  %v3614_v42 = vsel %vm498_vm3, %v3606_v37, -inf }
0x200a   : > { %3615 = vmax.xlane.f32.xlu1 %v3614_v42 }
0x2096   : > { %v3619_v14 = vpop.xlane.xlu0 %3618 }
0x2097   : > { %v3621_v29 = vsub.f32 %v3611_v31, %v3619_v14  ;;  %v3616_v24 = vpop.xlane.xlu1 %3615 }
0x2098   : > { %v3620_v23 = vsub.f32 %v3606_v37, %v3616_v24 }
0x2099   : > { %v3624_v47 = vmul.f32 1.442695, %v3621_v29 }
0x209a   : > { %v3622_v25 = vmul.f32 1.442695, %v3620_v23 }
0x209b   : > { %4968 = vpow2.f32 %v3624_v47 }
0x209c   : > { %4970 = vpow2.f32 %v3622_v25 }
0x20a5   : > { %v5533_v51 = vpop.eup %4968 }
0x20a6   : > { %v4971_v32 = vpop.eup %4970  ;;  %v3629_v33 = vsel %vm498_vm3, %v5533_v51, 0.0 }
0x20a7   : > { %3630 = vadd.xlane.f32.xlu1 %v3629_v33  ;;  %v3626_v52 = vsel %vm498_vm3, %v4971_v32, 0.0 }
0x20a8   : > { %3627 = vadd.xlane.f32.xlu0 %v3626_v52 }
0x20b8   : > { %812 = vrot.lane.b32.xlu1 %v5190_v26, %s4996_s7 }
0x20bc   : > { %814 = vrot.lane.b32.xlu1 %v5188_v17, %s4996_s7 }
0x20be   : > { %4844 = vrot.lane.b32.xlu0 %v5437_v44, %s4995_s27 }
0x20c0   : > { %1025 = vrot.lane.b32.xlu1 %v5192_v27, %s4997_s9 }
0x20c2   : > { %1023 = vrot.lane.b32.xlu0 %v5194_v28, %s4997_s9 }
0x20c4   : > { %1236 = vrot.lane.b32.xlu1 %v5228_v62, %s4998_s10  ;;  %v3741_v62 = vld [vmem:[%s5647_s3] sm:$0xff] }
0x20c6   : > { %1234 = vrot.lane.b32.xlu0 %v5230_v63, %s4998_s10  ;;  %v3742_v63 = vld [vmem:[%s5647_s3 + $0x8] sm:$0xff] }
0x20c8   : > { %1647 = vrot.lane.b32.xlu1 %v5278_v34, %s4996_s7 }
0x20ca   : > { %1645 = vrot.lane.b32.xlu0 %v5280_v35, %s4996_s7 }
0x20cc   : > { %1857 = vrot.lane.b32.xlu1 %v5304_v3, %s4997_s9 }
0x20ce   : > { %1855 = vrot.lane.b32.xlu0 %v5306_v4, %s4997_s9 }
0x20d0   : > { %2067 = vrot.lane.b32.xlu1 %v5340_v54, %s4998_s10  ;;  %v4658_v54 = vpack.c.bf16 %v3742_v63, %v3741_v62 }
0x20d2   : > { %2065 = vrot.lane.b32.xlu0 %v5342_v21, %s4998_s10 }
0x20d4   : > { %2477 = vrot.lane.b32.xlu1 %v5390_v12, %s4996_s7 }
0x20d6   : > { %2475 = vrot.lane.b32.xlu0 %v5392_v13, %s4996_s7  ;;  %v3743_v13 = vld [vmem:[%s5647_s3 + $0x10] sm:$0xff] }
0x20d8   : > { %2687 = vrot.lane.b32.xlu1 %v5416_v48, %s4997_s9  ;;  %v3744_v48 = vld [vmem:[%s5647_s3 + $0x18] sm:$0xff] }
0x20da   : > { %2685 = vrot.lane.b32.xlu0 %v5418_v1, %s4997_s9 }
0x20dc   : > { %2897 = vrot.lane.b32.xlu1 %v5453_v56, %s4998_s10 }
0x20de   : > { %2895 = vrot.lane.b32.xlu0 %v5455_v57, %s4998_s10 }
0x20e0   : > { %3307 = vrot.lane.b32.xlu1 %v5503_v45, %s4996_s7 }
0x20e2   : > { %3305 = vrot.lane.b32.xlu0 %v5505_v46, %s4996_s7  ;;  %v4662_v46 = vpack.c.bf16 %v3744_v48, %v3743_v13 }
0x20e4   : > { %3517 = vrot.lane.b32.xlu1 %v4455_v11, %s4997_s9  ;;  %v4059_v11 = vld [vmem:[%s5648_s4] ss:$0 sm:$0xff] }
0x20e6   : > { %3515 = vrot.lane.b32.xlu0 %v3504_v15, %s4997_s9 }
0x2134   : > { %v3631_v17 = vpop.xlane.xlu1 %3630 }
0x2135   : > { %4972 = vrcp.f32 %v3631_v17  ;;  %v3628_v26 = vpop.xlane.xlu0 %3627 }
0x2136   : > { %4974 = vrcp.f32 %v3628_v26 }
0x2138   : > { %v813_v27 = vpop.permute.xlu1 %812 }
0x2139   : > { %819 = vst.msk [vmem:[#allocation2] sm:$0xff] %vm818_vm4, %v813_v27  ;;  %v4845_v28 = vpop.permute.xlu0 %4844 }
0x213a   : > { %v4847_v34 = vunpack.i.h.bf16 %v4845_v28  ;;  %v4846_v35 = vunpack.i.l.bf16 %v4845_v28 }
0x213c   : > { %v4654_v3 = vpack.c.bf16 %v4847_v34, %v4846_v35  ;;  %v815_v4 = vpop.permute.xlu1 %814 }
0x213d   : > { %820 = vst.msk [vmem:[#allocation2 + $0x8] sm:$0xff] %vm818_vm4, %v815_v4  ;;  %v1024_v21 = vpop.permute.xlu0 %1023 }
0x213e   : > { %1030 = vst.msk [vmem:[#allocation2] sm:$0xff] %vm1029_vm5, %v1024_v21  ;;  %4655 = vmatprep.subr.bf16.mxu1 %v4654_v3 }
0x213f   : > { %v4973_v12 = vpop.eup %4972  ;;  %4657 = vmatpush3.bf16.msra.mxu1 %v4654_v3 }
0x2140   : > { %v4975_v1 = vpop.eup %4974  ;;  %v1026_v44 = vpop.permute.xlu1 %1025  ;;  %4659 = vmatprep.subr.bf16.mxu1 %v4658_v54  ;;  %v3635_v45 = vmul.f32 %v4973_v12, %v5533_v51 }
0x2141   : > { %1031 = vst.msk [vmem:[#allocation2 + $0x8] sm:$0xff] %vm1029_vm5, %v1026_v44  ;;  %v1235_v56 = vpop.permute.xlu0 %1234  ;;  %v3634_v57 = vmul.f32 %v4975_v1, %v4971_v32 }
0x2142   : > { %1241 = vst.msk [vmem:[#allocation2] sm:$0xff] %vm1240_vm6, %v1235_v56 }
0x2143   : > { %4467 = vmatprep.mubr.msk.f32.mxu1 %vm498_vm3, %v3634_v57 }
0x2144   : > { %4468 = vmatmul.mubr.msk.f32.vlgmr.msra.gmra.mrb[30].mxu1 %vm498_vm3, %v3635_v45  ;;  %v1237_v20 = vpop.permute.xlu1 %1236 }
0x2145   : > { %1242 = vst.msk [vmem:[#allocation2 + $0x8] sm:$0xff] %vm1240_vm6, %v1237_v20  ;;  %v1646_v50 = vpop.permute.xlu0 %1645  ;;  %4661 = vmatpush3.bf16.msra.mxu1 %v4658_v54 }
0x2146   : > { %1651 = vst.msk [vmem:[#allocation2 + $0x10] sm:$0xff] %vm818_vm4, %v1646_v50  ;;  %4663 = vmatprep.subr.bf16.mxu1 %v4662_v46 }
0x2148   : > { %v1648_v53 = vpop.permute.xlu1 %1647 }
0x2149   : > { %1652 = vst.msk [vmem:[#allocation2 + $0x18] sm:$0xff] %vm818_vm4, %v1648_v53  ;;  %v1856_v41 = vpop.permute.xlu0 %1855  ;;  %4665 = vmatpush3.bf16.msra.mxu1 %v4662_v46  ;;  %v3733_v55 = vld [vmem:[#allocation2] sm:$0xff] }
0x214a   : > { %1861 = vst.msk [vmem:[#allocation2 + $0x10] sm:$0xff] %vm1029_vm5, %v1856_v41  ;;  %4478 = vmatprep.mubr.msk.f32.mxu1 %vm274_vm0, %v3733_v55 }
0x214c   : > { %v1858_v58 = vpop.permute.xlu1 %1857  ;;  %v3734_v59 = vld [vmem:[#allocation2 + $0x8] sm:$0xff] }
0x214d   : > { %1862 = vst.msk [vmem:[#allocation2 + $0x18] sm:$0xff] %vm1029_vm5, %v1858_v58  ;;  %v2066_v60 = vpop.permute.xlu0 %2065  ;;  %4479 = vmatmul.mubr.msk.f32.vlgmr.msra.gmra.mrb[32].mxu1 %vm274_vm0, %v3734_v59 }
0x214e   : > { %2071 = vst.msk [vmem:[#allocation2 + $0x10] sm:$0xff] %vm1240_vm6, %v2066_v60 }
0x2150   : > { %v2068_v40 = vpop.permute.xlu1 %2067 }
0x2151   : > { %2072 = vst.msk [vmem:[#allocation2 + $0x18] sm:$0xff] %vm1240_vm6, %v2068_v40  ;;  %v2476_v19 = vpop.permute.xlu0 %2475 }
0x2152   : > { %2481 = vst.msk [vmem:[#allocation2 + $0x20] sm:$0xff] %vm818_vm4, %v2476_v19 }
0x2154   : > { %v2478_v39 = vpop.permute.xlu1 %2477 }
0x2155   : > { %2482 = vst.msk [vmem:[#allocation2 + $0x28] sm:$0xff] %vm818_vm4, %v2478_v39  ;;  %v2686_v61 = vpop.permute.xlu0 %2685  ;;  %v3735_v49 = vld [vmem:[#allocation2 + $0x10] sm:$0xff] }
0x2156   : > { %2691 = vst.msk [vmem:[#allocation2 + $0x20] sm:$0xff] %vm1029_vm5, %v2686_v61  ;;  %4481 = vmatprep.mubr.msk.f32.mxu1 %vm274_vm0, %v3735_v49 }
0x2158   : > { %v2688_v0 = vpop.permute.xlu1 %2687  ;;  %v3736_v2 = vld [vmem:[#allocation2 + $0x18] sm:$0xff] }
0x2159   : > { %2692 = vst.msk [vmem:[#allocation2 + $0x28] sm:$0xff] %vm1029_vm5, %v2688_v0  ;;  %v2896_v16 = vpop.permute.xlu0 %2895  ;;  %4482 = vmatmul.mubr.msk.f32.gmra.mrb[34].mxu1 %vm274_vm0, %v3736_v2 }
0x215a   : > { %2901 = vst.msk [vmem:[#allocation2 + $0x20] sm:$0xff] %vm1240_vm6, %v2896_v16 }
0x215c   : > { %v2898_v5 = vpop.permute.xlu1 %2897 }
0x215d   : > { %2902 = vst.msk [vmem:[#allocation2 + $0x28] sm:$0xff] %vm1240_vm6, %v2898_v5  ;;  %v3306_v6 = vpop.permute.xlu0 %3305 }
0x215e   : > { %3311 = vst.msk [vmem:[#allocation2 + $0x30] sm:$0xff] %vm818_vm4, %v3306_v6 }
0x2160   : > { %v3308_v7 = vpop.permute.xlu1 %3307 }
0x2161   : > { %3312 = vst.msk [vmem:[#allocation2 + $0x38] sm:$0xff] %vm818_vm4, %v3308_v7  ;;  %v3516_v22 = vpop.permute.xlu0 %3515  ;;  %v3737_v18 = vld [vmem:[#allocation2 + $0x20] sm:$0xff] }
0x2162   : > { %3521 = vst.msk [vmem:[#allocation2 + $0x30] sm:$0xff] %vm1029_vm5, %v3516_v22  ;;  %4484 = vmatprep.mubr.msk.f32.mxu1 %vm274_vm0, %v3737_v18 }
0x2164   : > { %v3518_v43 = vpop.permute.xlu1 %3517  ;;  %v3738_v8 = vld [vmem:[#allocation2 + $0x28] sm:$0xff] }
0x2165   : > { %3522 = vst.msk [vmem:[#allocation2 + $0x38] sm:$0xff] %vm1029_vm5, %v3518_v43  ;;  %4485 = vmatmul.mubr.msk.f32.gmra.mrb[36].mxu1 %vm274_vm0, %v3738_v8 }
0x2217   : > { %v4469_v9 = vpop.f32.mrb[30].mxu1 }
0x2218   : > { %3727 = vrot.lane.b32.xlu1 %v4469_v9, %s4998_s10  ;;  %v3714_v10 = vpop.f32.mrb[31].mxu1 }
0x2219   : > { %3725 = vrot.lane.b32.xlu0 %v3714_v10, %s4998_s10 }
0x2220   : > { %v4480_v15 = vpop.f32.mrb[32].mxu1 }
0x2221   : > { %v3848_v30 = vadd.f32 %v4480_v15, %v4059_v11  ;;  %v3842_v31 = vpop.f32.mrb[33].mxu1 }
0x2222   : > { %v3843_v36 = vadd.f32 %v4059_v11, %v3842_v31 }
0x2223   : > { %3882 = vst.msk [vmem:[%s5619_s24 + $0x8] sm:$0xff] %vm274_vm0, %v3848_v30 }
0x2224   : > { %3881 = vst.msk [vmem:[%s5619_s24] sm:$0xff] %vm274_vm0, %v3843_v36 }
0x222c   : > { %v4483_v37 = vpop.f32.mrb[34].mxu1 }
0x222d   : > { %v3858_v38 = vadd.f32 %v4483_v37, %v4059_v11  ;;  %v3852_v42 = vpop.f32.mrb[35].mxu1 }
0x222e   : > { %v3853_v14 = vadd.f32 %v4059_v11, %v3852_v42 }
0x222f   : > { %3884 = vst.msk [vmem:[%s5619_s24 + $0x18] sm:$0xff] %vm274_vm0, %v3858_v38 }
0x2230   : > { %3883 = vst.msk [vmem:[%s5619_s24 + $0x10] sm:$0xff] %vm274_vm0, %v3853_v14 }
0x2238   : > { %v4486_v29 = vpop.f32.mrb[36].mxu1 }
0x2239   : > { %v3868_v24 = vadd.f32 %v4486_v29, %v4059_v11  ;;  %v3862_v23 = vpop.f32.mrb[37].mxu1 }
0x223a   : > { %v3863_v47 = vadd.f32 %v4059_v11, %v3862_v23 }
0x223b   : > { %3886 = vst.msk [vmem:[%s5619_s24 + $0x28] sm:$0xff] %vm274_vm0, %v3868_v24 }
0x223c   : > { %3885 = vst.msk [vmem:[%s5619_s24 + $0x20] sm:$0xff] %vm274_vm0, %v3863_v47 }
0x228a   : > { %v3728_v25 = vpop.permute.xlu1 %3727 }
0x228b   : > { %3732 = vst.msk [vmem:[#allocation2 + $0x38] sm:$0xff] %vm1240_vm6, %v3728_v25  ;;  %v3726_v51 = vpop.permute.xlu0 %3725 }
0x228c   : > { %3731 = vst.msk [vmem:[#allocation2 + $0x30] sm:$0xff] %vm1240_vm6, %v3726_v51 }
0x2292   : > { %v3740_v33 = vld [vmem:[#allocation2 + $0x38] sm:$0xff] }
0x2293   : > { %v3739_v32 = vld [vmem:[#allocation2 + $0x30] sm:$0xff] }
0x2294   : > { %4487 = vmatprep.mubr.msk.f32.mxu1 %vm274_vm0, %v3739_v32 }
0x2295   : > { %4488 = vmatmul.mubr.msk.f32.gmra.mrb[38].mxu1 %vm274_vm0, %v3740_v33 }
0x2368   : > { %v4489_v52 = vpop.f32.mrb[38].mxu1 }
0x2369   : > { %v3878_v17 = vadd.f32 %v4489_v52, %v4059_v11  ;;  %v3872_v26 = vpop.f32.mrb[39].mxu1 }
0x236a   : > { %v3873_v27 = vadd.f32 %v4059_v11, %v3872_v26 }
0x236b   : > { %3888 = vst.msk [vmem:[%s5619_s24 + $0x38] sm:$0xff] %vm274_vm0, %v3878_v17 }
0x236c   : > { %3887 = vst.msk [vmem:[%s5619_s24 + $0x30] sm:$0xff] %vm274_vm0, %v3873_v27 }
0x236d PF: > { %s16_s21 = sadd.s32 1, %s4983_s21  }
0x236e   : > { %p13_p4 = scmp.ge.s32.totalorder %s16_s21, 4  }
0x2370   :  { %15 = sbr.rel (!%p13_p4) target bundleno = 1 (0x1), region = 74 }

</bundles_post_ra>
